<compile_context>
chip_gen: v7x
topology: tpu7x:2x2x1
jax: 0.10.0
libtpu: 0.0.40
codegen_flags: <defaults>
</compile_context>

<pallas_src>
import functools
import math

import jax
import jax.numpy as jnp
import numpy as np
from jax.experimental import pallas as pl
from jax.experimental.pallas import tpu as pltpu


def _round_up(x, m):
    return ((x + m - 1) // m) * m


def _default_t_tile(d):
    """T-tile target sized against v7x's 64 MiB VMEM; larger on 128 MiB parts."""
    base = 512 if d <= 512 else 256
    try:
        if pltpu.get_tpu_info().vmem_capacity_bytes >= 96 * 1024 * 1024:
            base *= 2  # v5e / v6e: 128 MiB VMEM per TensorCore
    except Exception:
        pass
    return base


# -----------------------------------------------------------------------------
# Kernel A: fused K/V projection + online K column softmax + per-head KV
#           accumulation + folding of Wo into KV (emits Wraw for the Q pass).
# -----------------------------------------------------------------------------
def _kv_pass_kernel(xk_ref, xv_ref, wk_ref, wv_ref, bk_ref, bv_ref, wo_ref,
                    kvt_ref, wraw_ref, l_ref, m_ref,
                    *, num_heads, dh, scale, t_actual, t_tile):
    t_idx = pl.program_id(1)

    @pl.when(t_idx == 0)
    def _():
        m_ref[...] = jnp.full(m_ref.shape, -jnp.inf, dtype=m_ref.dtype)
        l_ref[...] = jnp.zeros(l_ref.shape, dtype=l_ref.dtype)
        kvt_ref[...] = jnp.zeros(kvt_ref.shape, dtype=kvt_ref.dtype)

    # Fused K / V projections for this T tile (bf16 MXU inputs, f32 accum).
    kp = jnp.dot(xk_ref[...].astype(jnp.bfloat16), wk_ref[...],
                 preferred_element_type=jnp.float32) + bk_ref[...]         # (tt, D)
    vp = (jnp.dot(xv_ref[...].astype(jnp.bfloat16), wv_ref[...],
                  preferred_element_type=jnp.float32)
          + bv_ref[...]).astype(jnp.bfloat16)                              # (tt, D)

    # Online column softmax over T (per K feature column).
    k = kp * scale
    m_tile = jnp.max(k, axis=0, keepdims=True)                             # (1, D)
    m_new = jnp.maximum(m_ref[...], m_tile)
    alpha = jnp.exp(m_ref[...] - m_new)                                    # (1, D)
    ke = jnp.exp(k - m_new)                                                # (tt, D)
    if t_actual % t_tile != 0:
        # Padded rows must not contribute to the softmax / KV.
        row = jax.lax.broadcasted_iota(jnp.int32, ke.shape, 0) + t_idx * t_tile
        ke = jnp.where(row < t_actual, ke, 0.0)
    l_ref[...] = alpha * l_ref[...] + jnp.sum(ke, axis=0, keepdims=True)
    m_ref[...] = m_new

    # Per-head unnormalized KV, accumulated TRANSPOSED and lane-dense:
    #   kvt[j, h*dh + i] = sum_t exp(k[t, h*dh+i] - m) * vp[t, h*dh+j]
    # so the online rescale (per K feature i) is a pure lane broadcast.
    ke_b = ke.astype(jnp.bfloat16)
    blocks = []
    for h in range(num_heads):
        lo = h * dh
        blocks.append(jax.lax.dot_general(
            vp[:, lo:lo + dh], ke_b[:, lo:lo + dh],
            (((0,), (0,)), ((), ())), preferred_element_type=jnp.float32))  # (dh, dh)
    kvt_ref[...] = kvt_ref[...] * alpha + jnp.concatenate(blocks, axis=-1)

    @pl.when(t_idx == pl.num_programs(1) - 1)
    def _():
        acc = kvt_ref[...]                                                  # (dh, D)
        wo = wo_ref[...]                                                    # (D, D)
        # Fold Wo into the (unnormalized) per-head KV:
        #   Wraw[h*dh+i, n] = sum_j acc[j, h*dh+i] * Wo[h*dh+j, n]
        # The 1/l normalization is folded lane-wise into the Q pass instead.
        rows = []
        for h in range(num_heads):
            lo = h * dh
            rows.append(jax.lax.dot_general(
                acc[:, lo:lo + dh].astype(jnp.bfloat16), wo[lo:lo + dh, :],
                (((0,), (0,)), ((), ())), preferred_element_type=jnp.float32))
        wraw_ref[...] = jnp.concatenate(rows, axis=0).astype(wraw_ref.dtype)
        # Module output KV (lane-dense, transposed): kvt[j, h*dh+i] = KV[h, i, j].
        # Exact division for the returned tensor (no approx-recip bias here).
        kvt_ref[...] = acc / l_ref[...]


def pallas_kv_pass(K, V, wk, wv, bk, bv, wo, *, num_heads, t_tile, t_actual):
    """K, V: (B, Tpad, Din) f32.  Returns kv_t (B, dh, D) f32,
    wraw (B, D, D) bf16, l (B, 1, D) f32."""
    B, Tpad, Din = K.shape
    D = wk.shape[1]
    dh = D // num_heads
    scale = float(dh) ** -0.25
    nt = Tpad // t_tile
    kernel = functools.partial(_kv_pass_kernel, num_heads=num_heads, dh=dh,
                               scale=scale, t_actual=t_actual, t_tile=t_tile)

    flops = B * Tpad * (4 * Din * D + 2 * D * dh) + B * 2 * D * dh * D
    transcendentals = B * Tpad * D
    bytes_accessed = (B * Tpad * Din * 4 * 2 + (2 * Din * D + D * D) * 2
                      + B * (dh * D * 4 + D * D * 2 + D * 4))

    return pl.pallas_call(
        kernel,
        out_shape=(jax.ShapeDtypeStruct((B, dh, D), jnp.float32),
                   jax.ShapeDtypeStruct((B, D, D), jnp.bfloat16),
                   jax.ShapeDtypeStruct((B, 1, D), jnp.float32)),
        grid=(B, nt),
        in_specs=[
            pl.BlockSpec((None, t_tile, Din), lambda b, t: (b, t, 0)),   # xk
            pl.BlockSpec((None, t_tile, Din), lambda b, t: (b, t, 0)),   # xv
            pl.BlockSpec((Din, D), lambda b, t: (0, 0)),                 # wk (resident)
            pl.BlockSpec((Din, D), lambda b, t: (0, 0)),                 # wv (resident)
            pl.BlockSpec((1, D), lambda b, t: (0, 0)),                   # bk
            pl.BlockSpec((1, D), lambda b, t: (0, 0)),                   # bv
            pl.BlockSpec((D, D), lambda b, t: (0, 0)),                   # wo (resident)
        ],
        out_specs=(
            pl.BlockSpec((None, dh, D), lambda b, t: (b, 0, 0)),         # kv_t
            pl.BlockSpec((None, D, D), lambda b, t: (b, 0, 0)),          # wraw
            pl.BlockSpec((None, 1, D), lambda b, t: (b, 0, 0)),          # l
        ),
        scratch_shapes=[pltpu.VMEM((1, D), jnp.float32)],                # running max m
        compiler_params=pltpu.CompilerParams(
            dimension_semantics=("parallel", "arbitrary"),
            # <=~28 MiB worst-case block footprint (tt<=1024, D<=1024); 48 MiB
            # keeps double buffering alive yet stays under v7x's 64 MiB VMEM.
            vmem_limit_bytes=48 * 1024 * 1024),
        cost_estimate=pl.CostEstimate(flops=flops, transcendentals=transcendentals,
                                      bytes_accessed=bytes_accessed),
    )(K, V, wk, wv, bk, bv, wo)


# -----------------------------------------------------------------------------
# Kernel B: fused Q projection + per-head Q softmax + O = Qsm_scaled @ Wraw + bo
# -----------------------------------------------------------------------------
def _q_pass_kernel(xq_ref, wq_ref, bq_ref, ind_ref, indt_ref, l_ref, wraw_ref,
                   bo_ref, o_ref, *, scale):
    # Fused Q projection (bf16 MXU inputs, f32 accum).
    qp = jnp.dot(xq_ref[...].astype(jnp.bfloat16), wq_ref[...],
                 preferred_element_type=jnp.float32) + bq_ref[...]          # (tt, D)
    q = qp * scale
    # Global per-row max is a valid stabilizer for every head.
    q = q - jnp.max(q, axis=-1, keepdims=True)
    qe = jnp.exp(q)                                                         # (tt, D)
    # Per-head softmax denominators via block-indicator matmuls (full-lane work,
    # MXU instead of H lane-sliced XLU reductions).
    den_h = jnp.dot(qe, ind_ref[...], preferred_element_type=jnp.float32)   # (tt, H)
    den = jnp.dot(den_h, indt_ref[...], preferred_element_type=jnp.float32) # (tt, D)
    # Fold the K-softmax denominator l (per K-feature lane) into the Q
    # normalization; floor guards against a fully-underflowed head block.
    qsm = qe * pl.reciprocal(jnp.maximum(den * l_ref[...], 1e-30), approx=True)
    # Single lane-full matmul replaces per-head (T,dh)@(dh,dh) + concat + Wo GEMM.
    o = jnp.dot(qsm.astype(jnp.bfloat16), wraw_ref[...],
                preferred_element_type=jnp.float32) + bo_ref[...]
    o_ref[...] = o.astype(o_ref.dtype)


def pallas_q_pass(Q, wq, bq, ind, indt, l, wraw, bo, *, num_heads, t_tile, o_dtype):
    B, Tpad, Din = Q.shape
    D = wq.shape[1]
    scale = float(D // num_heads) ** -0.25
    nt = Tpad // t_tile
    kernel = functools.partial(_q_pass_kernel, scale=scale)

    flops = B * Tpad * (2 * Din * D + 2 * D * num_heads + 2 * num_heads * D + 2 * D * D)
    transcendentals = B * Tpad * D
    bytes_accessed = (B * Tpad * (Din * 4 + D * jnp.dtype(o_dtype).itemsize)
                      + B * (D * D * 2 + D * 4) + Din * D * 2 + 3 * D * 4)

    return pl.pallas_call(
        kernel,
        out_shape=jax.ShapeDtypeStruct((B, Tpad, D), o_dtype),
        grid=(B, nt),
        in_specs=[
            pl.BlockSpec((None, t_tile, Din), lambda b, t: (b, t, 0)),   # xq
            pl.BlockSpec((Din, D), lambda b, t: (0, 0)),                 # wq (resident)
            pl.BlockSpec((1, D), lambda b, t: (0, 0)),                   # bq
            pl.BlockSpec((D, num_heads), lambda b, t: (0, 0)),           # head indicator
            pl.BlockSpec((num_heads, D), lambda b, t: (0, 0)),           # its transpose
            pl.BlockSpec((None, 1, D), lambda b, t: (b, 0, 0)),          # l (per batch)
            pl.BlockSpec((None, D, D), lambda b, t: (b, 0, 0)),          # wraw (per batch)
            pl.BlockSpec((1, D), lambda b, t: (0, 0)),                   # bo
        ],
        out_specs=pl.BlockSpec((None, t_tile, D), lambda b, t: (b, t, 0)),
        compiler_params=pltpu.CompilerParams(
            # Both axes parallel: T tiles feed v7x's second TensorCore at small B.
            dimension_semantics=("parallel", "parallel"),
            vmem_limit_bytes=48 * 1024 * 1024),
        cost_estimate=pl.CostEstimate(flops=flops, transcendentals=transcendentals,
                                      bytes_accessed=bytes_accessed),
    )(Q, wq, bq, ind, indt, l, wraw, bo)


# -----------------------------------------------------------------------------
# Module forward (glue in JAX, compute in Pallas)
# -----------------------------------------------------------------------------
def multi_head_linear_attention_forward(kparams, Q, K, V, *, num_heads,
                                         t_tile_target=None, o_dtype=jnp.float32):
    """Matches MultiHeadLinearAttention.forward: returns (O, KV)."""
    B, T, Din = Q.shape
    D = kparams["wq"].shape[1]
    assert K.shape == (B, T, Din) and V.shape == (B, T, Din)
    assert D % num_heads == 0
    dh = D // num_heads

    if t_tile_target is None:
        t_tile_target = _default_t_tile(max(D, Din))
    tt = min(t_tile_target, _round_up(T, 8))
    Tpad = _round_up(T, tt)
    if Tpad != T:
        pad = ((0, 0), (0, Tpad - T), (0, 0))
        Q = jnp.pad(Q, pad)
        K = jnp.pad(K, pad)
        V = jnp.pad(V, pad)

    # Pass A: K/V projection + online column softmax + per-head KV + Wo fold.
    kv_t, wraw, l = pallas_kv_pass(
        K, V, kparams["wk"], kparams["wv"], kparams["bk"], kparams["bv"],
        kparams["wo"], num_heads=num_heads, t_tile=tt, t_actual=T)

    # Pass B: Q projection + Q softmax + folded output projection.
    O = pallas_q_pass(Q, kparams["wq"], kparams["bq"], kparams["ind"],
                      kparams["indt"], l, wraw, kparams["bo"],
                      num_heads=num_heads, t_tile=tt, o_dtype=o_dtype)
    if Tpad != T:
        O = O[:, :T, :]

    # kv_t[b, j, h*dh + i] == KV[b, h, i, j]  ->  (B, H, dh, dh)  (tiny transpose)
    KV = kv_t.reshape(B, dh, num_heads, dh).transpose(0, 2, 3, 1)
    return O, KV


# -----------------------------------------------------------------------------
# Parameters
# -----------------------------------------------------------------------------
def init_params(key, dim_model):
    """PyTorch Linear-style uniform init; weights stored (in, out)."""
    bound = 1.0 / math.sqrt(dim_model)
    keys = jax.random.split(key, 8)

    def u(k, shape):
        return jax.random.uniform(k, shape, jnp.float32, -bound, bound)

    return {
        "wq": u(keys[0], (dim_model, dim_model)), "bq": u(keys[1], (1, dim_model)),
        "wk": u(keys[2], (dim_model, dim_model)), "bk": u(keys[3], (1, dim_model)),
        "wv": u(keys[4], (dim_model, dim_model)), "bv": u(keys[5], (1, dim_model)),
        "wo": u(keys[6], (dim_model, dim_model)), "bo": u(keys[7], (1, dim_model)),
    }


def prepare_kernel_params(params, num_heads):
    """One-time prep: bf16 weight cast + head block-indicator matrices."""
    D = params["wq"].shape[1]
    dh = D // num_heads
    heads = jnp.arange(D, dtype=jnp.int32) // dh
    ind = (heads[:, None] == jnp.arange(num_heads, dtype=jnp.int32)[None, :]
           ).astype(jnp.float32)                                   # (D, H)
    kp = {k: (v.astype(jnp.bfloat16) if k in ("wq", "wk", "wv", "wo") else v)
          for k, v in params.items()}
    kp["ind"] = ind
    kp["indt"] = jnp.transpose(ind)
    return kp


# -----------------------------------------------------------------------------
# Pure-JAX reference (f32) for a sanity check
# -----------------------------------------------------------------------------
def reference_forward(params, Q, K, V, *, num_heads):
    B, T, D = Q.shape
    dh = D // num_heads
    Qp = Q @ params["wq"] + params["bq"][0]
    Kp = K @ params["wk"] + params["bk"][0]
    Vp = V @ params["wv"] + params["bv"][0]
    Qh = Qp.reshape(B, T, num_heads, dh).transpose(0, 2, 1, 3)
    Kh = Kp.reshape(B, T, num_heads, dh).transpose(0, 2, 1, 3)
    Vh = Vp.reshape(B, T, num_heads, dh).transpose(0, 2, 1, 3)
    scale = dh ** 0.25
    KV = jnp.einsum("bhtd,bhte->bhde", jax.nn.softmax(Kh / scale, axis=-2), Vh)
    O = jnp.einsum("bhtd,bhde->bhte", jax.nn.softmax(Qh / scale, axis=-1), KV)
    O = O.transpose(0, 2, 1, 3).reshape(B, T, D)
    O = O @ params["wo"] + params["bo"][0]
    return O, KV


if __name__ == "__main__":
    # Small shapes consistent with the module: dim_model=32, num_heads=4, B=2, T=32.
    B, T, D, H = 2, 32, 32, 4
    dh = D // H

    key = jax.random.PRNGKey(0)
    kparam_key, kq, kk, kv = jax.random.split(key, 4)
    params = init_params(kparam_key, D)
    Q = jax.random.normal(kq, (B, T, D), jnp.float32)
    K = jax.random.normal(kk, (B, T, D), jnp.float32)
    V = jax.random.normal(kv, (B, T, D), jnp.float32)

    kparams = prepare_kernel_params(params, num_heads=H)   # weights cast ONCE
    fwd = jax.jit(functools.partial(multi_head_linear_attention_forward, num_heads=H))
    O, KV = fwd(kparams, Q, K, V)
    jax.block_until_ready((O, KV))

    # Sanity check vs. pure-f32 JAX reference (kernel uses bf16 MXU inputs with
    # f32 accumulation, so tolerances are relaxed accordingly).
    O_ref, KV_ref = reference_forward(params, Q, K, V, num_heads=H)
    assert O.shape == (B, T, D)
    assert KV.shape == (B, H, dh, dh)
    np.testing.assert_allclose(np.asarray(O), np.asarray(O_ref), rtol=2e-2, atol=2e-2)
    np.testing.assert_allclose(np.asarray(KV), np.asarray(KV_ref), rtol=2e-2, atol=2e-2)

    print("KERNEL_OK")
</pallas_src>

<mosaic_0001>
module attributes {stable_mosaic.version = 11 : i64} {
  func.func @_kv_pass_kernel(%arg0: i32, %arg1: i32, %arg2: memref<1x32x32xf32, #tpu.memory_space<vmem>>, %arg3: memref<1x32x32xf32, #tpu.memory_space<vmem>>, %arg4: memref<32x32xbf16, #tpu.memory_space<vmem>>, %arg5: memref<32x32xbf16, #tpu.memory_space<vmem>>, %arg6: memref<1x32xf32, #tpu.memory_space<vmem>>, %arg7: memref<1x32xf32, #tpu.memory_space<vmem>>, %arg8: memref<32x32xbf16, #tpu.memory_space<vmem>>, %arg9: memref<1x8x32xf32, #tpu.memory_space<vmem>>, %arg10: memref<1x32x32xbf16, #tpu.memory_space<vmem>>, %arg11: memref<1x1x32xf32, #tpu.memory_space<vmem>>, %arg12: memref<1x32xf32, #tpu.memory_space<vmem>>) attributes {dimension_semantics = [#tpu.dimension_semantics<parallel>, #tpu.dimension_semantics<arbitrary>], iteration_bounds = array<i64: 2, 1>, scalar_prefetch = 0 : i64, scratch_operands = 1 : i64, tpu.core_type = #tpu.core_type<tc>, window_params = [{transform_indices = @transform_0, window_bounds = array<i64: 1, 32, 32>}, {transform_indices = @transform_1, window_bounds = array<i64: 1, 32, 32>}, {pipeline_mode = #tpu.pipeline_mode<synchronous>, transform_indices = @transform_2, window_bounds = array<i64: 32, 32>}, {pipeline_mode = #tpu.pipeline_mode<synchronous>, transform_indices = @transform_3, window_bounds = array<i64: 32, 32>}, {pipeline_mode = #tpu.pipeline_mode<synchronous>, transform_indices = @transform_4, window_bounds = array<i64: 1, 32>}, {pipeline_mode = #tpu.pipeline_mode<synchronous>, transform_indices = @transform_5, window_bounds = array<i64: 1, 32>}, {pipeline_mode = #tpu.pipeline_mode<synchronous>, transform_indices = @transform_6, window_bounds = array<i64: 32, 32>}, {transform_indices = @transform_7, window_bounds = array<i64: 1, 8, 32>}, {transform_indices = @transform_8, window_bounds = array<i64: 1, 32, 32>}, {transform_indices = @transform_9, window_bounds = array<i64: 1, 1, 32>}]} {
    %c0_i32 = arith.constant 0 : i32
    %0 = arith.cmpi eq, %arg1, %c0_i32 : i32
    %1 = arith.extui %0 : i1 to i32
    %c0_i32_0 = arith.constant 0 : i32
    %2 = arith.cmpi ne, %1, %c0_i32_0 : i32
    scf.if %2 {
      %cst_42 = arith.constant 0xFF800000 : f32
      %67 = vector.broadcast %cst_42 : f32 to vector<1x32xf32>
      %c0_43 = arith.constant 0 : index
      %c0_44 = arith.constant 0 : index
      %68 = vector.load %arg12[%c0_43, %c0_44] : memref<1x32xf32, #tpu.memory_space<vmem>>, vector<1x32xf32>
      tpu.vector_store %arg12[%c0_43, %c0_44], %67 {strides = array<i32>} : memref<1x32xf32, #tpu.memory_space<vmem>>, vector<1x32xf32>,
      %cst_45 = arith.constant 0.000000e+00 : f32
      %69 = vector.broadcast %cst_45 : f32 to vector<1x32xf32>
      %c0_46 = arith.constant 0 : index
      %c0_47 = arith.constant 0 : index
      %c0_48 = arith.constant 0 : index
      %70 = vector.load %arg11[%c0_46, %c0_47, %c0_48] : memref<1x1x32xf32, #tpu.memory_space<vmem>>, vector<1x1x32xf32>
      %71 = vector.shape_cast %70 : vector<1x1x32xf32> to vector<1x32xf32>
      %72 = vector.shape_cast %69 : vector<1x32xf32> to vector<1x1x32xf32>
      tpu.vector_store %arg11[%c0_46, %c0_47, %c0_48], %72 {strides = array<i32>} : memref<1x1x32xf32, #tpu.memory_space<vmem>>, vector<1x1x32xf32>,
      %cst_49 = arith.constant 0.000000e+00 : f32
      %73 = vector.broadcast %cst_49 : f32 to vector<8x32xf32>
      %c0_50 = arith.constant 0 : index
      %c0_51 = arith.constant 0 : index
      %c0_52 = arith.constant 0 : index
      %74 = vector.load %arg9[%c0_50, %c0_51, %c0_52] : memref<1x8x32xf32, #tpu.memory_space<vmem>>, vector<1x8x32xf32>
      %75 = vector.shape_cast %74 : vector<1x8x32xf32> to vector<8x32xf32>
      %76 = vector.shape_cast %73 : vector<8x32xf32> to vector<1x8x32xf32>
      tpu.vector_store %arg9[%c0_50, %c0_51, %c0_52], %76 {strides = array<i32>} : memref<1x8x32xf32, #tpu.memory_space<vmem>>, vector<1x8x32xf32>,
    } else {
    }
    %c0 = arith.constant 0 : index
    %c0_1 = arith.constant 0 : index
    %c0_2 = arith.constant 0 : index
    %3 = vector.load %arg2[%c0, %c0_1, %c0_2] : memref<1x32x32xf32, #tpu.memory_space<vmem>>, vector<1x32x32xf32>
    %4 = vector.shape_cast %3 : vector<1x32x32xf32> to vector<32x32xf32>
    %5 = arith.truncf %4 : vector<32x32xf32> to vector<32x32xbf16>
    %c0_3 = arith.constant 0 : index
    %c0_4 = arith.constant 0 : index
    %6 = vector.load %arg4[%c0_3, %c0_4] : memref<32x32xbf16, #tpu.memory_space<vmem>>, vector<32x32xbf16>
    %cst = arith.constant dense<0.000000e+00> : vector<32x32xf32>
    %7 = tpu.matmul %5, %6, %cst {dimension_numbers = #tpu.dot_dimension_numbers<[1], [0], [0], [1], [0, 0, 1, 1], [], []>} : vector<32x32xbf16>, vector<32x32xbf16>, vector<32x32xf32> -> vector<32x32xf32>
    %c0_5 = arith.constant 0 : index
    %c0_6 = arith.constant 0 : index
    %8 = vector.load %arg6[%c0_5, %c0_6] : memref<1x32xf32, #tpu.memory_space<vmem>>, vector<1x32xf32>
    %9 = vector.broadcast %8 : vector<1x32xf32> to vector<32x32xf32>
    %10 = arith.addf %7, %9 : vector<32x32xf32>
    %c0_7 = arith.constant 0 : index
    %c0_8 = arith.constant 0 : index
    %c0_9 = arith.constant 0 : index
    %11 = vector.load %arg3[%c0_7, %c0_8, %c0_9] : memref<1x32x32xf32, #tpu.memory_space<vmem>>, vector<1x32x32xf32>
    %12 = vector.shape_cast %11 : vector<1x32x32xf32> to vector<32x32xf32>
    %13 = arith.truncf %12 : vector<32x32xf32> to vector<32x32xbf16>
    %c0_10 = arith.constant 0 : index
    %c0_11 = arith.constant 0 : index
    %14 = vector.load %arg5[%c0_10, %c0_11] : memref<32x32xbf16, #tpu.memory_space<vmem>>, vector<32x32xbf16>
    %cst_12 = arith.constant dense<0.000000e+00> : vector<32x32xf32>
    %15 = tpu.matmul %13, %14, %cst_12 {dimension_numbers = #tpu.dot_dimension_numbers<[1], [0], [0], [1], [0, 0, 1, 1], [], []>} : vector<32x32xbf16>, vector<32x32xbf16>, vector<32x32xf32> -> vector<32x32xf32>
    %c0_13 = arith.constant 0 : index
    %c0_14 = arith.constant 0 : index
    %16 = vector.load %arg7[%c0_13, %c0_14] : memref<1x32xf32, #tpu.memory_space<vmem>>, vector<1x32xf32>
    %17 = vector.broadcast %16 : vector<1x32xf32> to vector<32x32xf32>
    %18 = arith.addf %15, %17 : vector<32x32xf32>
    %19 = arith.truncf %18 : vector<32x32xf32> to vector<32x32xbf16>
    %cst_15 = arith.constant 0.594603539 : f32
    %20 = vector.broadcast %cst_15 : f32 to vector<32x32xf32>
    %21 = arith.mulf %10, %20 : vector<32x32xf32>
    %cst_16 = arith.constant dense<0xFF800000> : vector<32xf32>
    %22 = vector.multi_reduction <maximumf>, %21, %cst_16 [0] : vector<32x32xf32> to vector<32xf32>
    %23 = vector.shape_cast %22 : vector<32xf32> to vector<1x32xf32>
    %c0_17 = arith.constant 0 : index
    %c0_18 = arith.constant 0 : index
    %24 = vector.load %arg12[%c0_17, %c0_18] : memref<1x32xf32, #tpu.memory_space<vmem>>, vector<1x32xf32>
    %25 = arith.maximumf %24, %23 : vector<1x32xf32>
    %c0_19 = arith.constant 0 : index
    %c0_20 = arith.constant 0 : index
    %26 = vector.load %arg12[%c0_19, %c0_20] : memref<1x32xf32, #tpu.memory_space<vmem>>, vector<1x32xf32>
    %27 = arith.subf %26, %25 : vector<1x32xf32>
    %28 = math.exp %27 : vector<1x32xf32>
    %29 = vector.broadcast %25 : vector<1x32xf32> to vector<32x32xf32>
    %30 = arith.subf %21, %29 : vector<32x32xf32>
    %31 = math.exp %30 : vector<32x32xf32>
    %c0_21 = arith.constant 0 : index
    %c0_22 = arith.constant 0 : index
    %c0_23 = arith.constant 0 : index
    %32 = vector.load %arg11[%c0_21, %c0_22, %c0_23] : memref<1x1x32xf32, #tpu.memory_space<vmem>>, vector<1x1x32xf32>
    %33 = vector.shape_cast %32 : vector<1x1x32xf32> to vector<1x32xf32>
    %34 = arith.mulf %28, %33 : vector<1x32xf32>
    %cst_24 = arith.constant dense<0.000000e+00> : vector<32xf32>
    %35 = vector.multi_reduction <add>, %31, %cst_24 [0] : vector<32x32xf32> to vector<32xf32>
    %36 = vector.shape_cast %35 : vector<32xf32> to vector<1x32xf32>
    %37 = arith.addf %34, %36 : vector<1x32xf32>
    %c0_25 = arith.constant 0 : index
    %c0_26 = arith.constant 0 : index
    %c0_27 = arith.constant 0 : index
    %38 = vector.load %arg11[%c0_25, %c0_26, %c0_27] : memref<1x1x32xf32, #tpu.memory_space<vmem>>, vector<1x1x32xf32>
    %39 = vector.shape_cast %38 : vector<1x1x32xf32> to vector<1x32xf32>
    %40 = vector.shape_cast %37 : vector<1x32xf32> to vector<1x1x32xf32>
    tpu.vector_store %arg11[%c0_25, %c0_26, %c0_27], %40 {strides = array<i32>} : memref<1x1x32xf32, #tpu.memory_space<vmem>>, vector<1x1x32xf32>,
    %c0_28 = arith.constant 0 : index
    %c0_29 = arith.constant 0 : index
    %41 = vector.load %arg12[%c0_28, %c0_29] : memref<1x32xf32, #tpu.memory_space<vmem>>, vector<1x32xf32>
    tpu.vector_store %arg12[%c0_28, %c0_29], %25 {strides = array<i32>} : memref<1x32xf32, #tpu.memory_space<vmem>>, vector<1x32xf32>,
    %42 = arith.truncf %31 : vector<32x32xf32> to vector<32x32xbf16>
    %43 = vector.extract_strided_slice %19 {offsets = [0, 0], sizes = [32, 8], strides = [1, 1]} : vector<32x32xbf16> to vector<32x8xbf16>
    %44 = vector.extract_strided_slice %42 {offsets = [0, 0], sizes = [32, 8], strides = [1, 1]} : vector<32x32xbf16> to vector<32x8xbf16>
    %cst_30 = arith.constant dense<0.000000e+00> : vector<8x8xf32>
    %45 = tpu.matmul %43, %44, %cst_30 {dimension_numbers = #tpu.dot_dimension_numbers<[0], [0], [1], [1], [0, 1, 1, 1], [], []>} : vector<32x8xbf16>, vector<32x8xbf16>, vector<8x8xf32> -> vector<8x8xf32>
    %46 = vector.extract_strided_slice %19 {offsets = [0, 8], sizes = [32, 8], strides = [1, 1]} : vector<32x32xbf16> to vector<32x8xbf16>
    %47 = vector.extract_strided_slice %42 {offsets = [0, 8], sizes = [32, 8], strides = [1, 1]} : vector<32x32xbf16> to vector<32x8xbf16>
    %cst_31 = arith.constant dense<0.000000e+00> : vector<8x8xf32>
    %48 = tpu.matmul %46, %47, %cst_31 {dimension_numbers = #tpu.dot_dimension_numbers<[0], [0], [1], [1], [0, 1, 1, 1], [], []>} : vector<32x8xbf16>, vector<32x8xbf16>, vector<8x8xf32> -> vector<8x8xf32>
    %49 = vector.extract_strided_slice %19 {offsets = [0, 16], sizes = [32, 8], strides = [1, 1]} : vector<32x32xbf16> to vector<32x8xbf16>
    %50 = vector.extract_strided_slice %42 {offsets = [0, 16], sizes = [32, 8], strides = [1, 1]} : vector<32x32xbf16> to vector<32x8xbf16>
    %cst_32 = arith.constant dense<0.000000e+00> : vector<8x8xf32>
    %51 = tpu.matmul %49, %50, %cst_32 {dimension_numbers = #tpu.dot_dimension_numbers<[0], [0], [1], [1], [0, 1, 1, 1], [], []>} : vector<32x8xbf16>, vector<32x8xbf16>, vector<8x8xf32> -> vector<8x8xf32>
    %52 = vector.extract_strided_slice %19 {offsets = [0, 24], sizes = [32, 8], strides = [1, 1]} : vector<32x32xbf16> to vector<32x8xbf16>
    %53 = vector.extract_strided_slice %42 {offsets = [0, 24], sizes = [32, 8], strides = [1, 1]} : vector<32x32xbf16> to vector<32x8xbf16>
    %cst_33 = arith.constant dense<0.000000e+00> : vector<8x8xf32>
    %54 = tpu.matmul %52, %53, %cst_33 {dimension_numbers = #tpu.dot_dimension_numbers<[0], [0], [1], [1], [0, 1, 1, 1], [], []>} : vector<32x8xbf16>, vector<32x8xbf16>, vector<8x8xf32> -> vector<8x8xf32>
    %c0_34 = arith.constant 0 : index
    %c0_35 = arith.constant 0 : index
    %c0_36 = arith.constant 0 : index
    %55 = vector.load %arg9[%c0_34, %c0_35, %c0_36] : memref<1x8x32xf32, #tpu.memory_space<vmem>>, vector<1x8x32xf32>
    %56 = vector.shape_cast %55 : vector<1x8x32xf32> to vector<8x32xf32>
    %57 = vector.broadcast %28 : vector<1x32xf32> to vector<8x32xf32>
    %58 = arith.mulf %56, %57 : vector<8x32xf32>
    %59 = tpu.concatenate %45, %48, %51, %54 in 1 : vector<8x8xf32>, vector<8x8xf32>, vector<8x8xf32>, vector<8x8xf32> -> vector<8x32xf32>
    %60 = arith.addf %58, %59 : vector<8x32xf32>
    %c0_37 = arith.constant 0 : index
    %c0_38 = arith.constant 0 : index
    %c0_39 = arith.constant 0 : index
    %61 = vector.load %arg9[%c0_37, %c0_38, %c0_39] : memref<1x8x32xf32, #tpu.memory_space<vmem>>, vector<1x8x32xf32>
    %62 = vector.shape_cast %61 : vector<1x8x32xf32> to vector<8x32xf32>
    %63 = vector.shape_cast %60 : vector<8x32xf32> to vector<1x8x32xf32>
    tpu.vector_store %arg9[%c0_37, %c0_38, %c0_39], %63 {strides = array<i32>} : memref<1x8x32xf32, #tpu.memory_space<vmem>>, vector<1x8x32xf32>,
    %c0_i32_40 = arith.constant 0 : i32
    %64 = arith.cmpi eq, %arg1, %c0_i32_40 : i32
    %65 = arith.extui %64 : i1 to i32
    %c0_i32_41 = arith.constant 0 : i32
    %66 = arith.cmpi ne, %65, %c0_i32_41 : i32
    scf.if %66 {
      %c0_42 = arith.constant 0 : index
      %c0_43 = arith.constant 0 : index
      %c0_44 = arith.constant 0 : index
      %67 = vector.load %arg9[%c0_42, %c0_43, %c0_44] : memref<1x8x32xf32, #tpu.memory_space<vmem>>, vector<1x8x32xf32>
      %68 = vector.shape_cast %67 : vector<1x8x32xf32> to vector<8x32xf32>
      %c0_45 = arith.constant 0 : index
      %c0_46 = arith.constant 0 : index
      %69 = vector.load %arg8[%c0_45, %c0_46] : memref<32x32xbf16, #tpu.memory_space<vmem>>, vector<32x32xbf16>
      %70 = vector.extract_strided_slice %68 {offsets = [0, 0], sizes = [8, 8], strides = [1, 1]} : vector<8x32xf32> to vector<8x8xf32>
      %71 = arith.truncf %70 : vector<8x8xf32> to vector<8x8xbf16>
      %72 = vector.extract_strided_slice %69 {offsets = [0, 0], sizes = [8, 32], strides = [1, 1]} : vector<32x32xbf16> to vector<8x32xbf16>
      %cst_47 = arith.constant dense<0.000000e+00> : vector<8x32xf32>
      %73 = tpu.matmul %71, %72, %cst_47 {dimension_numbers = #tpu.dot_dimension_numbers<[0], [0], [1], [1], [0, 1, 1, 1], [], []>} : vector<8x8xbf16>, vector<8x32xbf16>, vector<8x32xf32> -> vector<8x32xf32>
      %74 = vector.extract_strided_slice %68 {offsets = [0, 8], sizes = [8, 8], strides = [1, 1]} : vector<8x32xf32> to vector<8x8xf32>
      %75 = arith.truncf %74 : vector<8x8xf32> to vector<8x8xbf16>
      %76 = vector.extract_strided_slice %69 {offsets = [8, 0], sizes = [8, 32], strides = [1, 1]} : vector<32x32xbf16> to vector<8x32xbf16>
      %cst_48 = arith.constant dense<0.000000e+00> : vector<8x32xf32>
      %77 = tpu.matmul %75, %76, %cst_48 {dimension_numbers = #tpu.dot_dimension_numbers<[0], [0], [1], [1], [0, 1, 1, 1], [], []>} : vector<8x8xbf16>, vector<8x32xbf16>, vector<8x32xf32> -> vector<8x32xf32>
      %78 = vector.extract_strided_slice %68 {offsets = [0, 16], sizes = [8, 8], strides = [1, 1]} : vector<8x32xf32> to vector<8x8xf32>
      %79 = arith.truncf %78 : vector<8x8xf32> to vector<8x8xbf16>
      %80 = vector.extract_strided_slice %69 {offsets = [16, 0], sizes = [8, 32], strides = [1, 1]} : vector<32x32xbf16> to vector<8x32xbf16>
      %cst_49 = arith.constant dense<0.000000e+00> : vector<8x32xf32>
      %81 = tpu.matmul %79, %80, %cst_49 {dimension_numbers = #tpu.dot_dimension_numbers<[0], [0], [1], [1], [0, 1, 1, 1], [], []>} : vector<8x8xbf16>, vector<8x32xbf16>, vector<8x32xf32> -> vector<8x32xf32>
      %82 = vector.extract_strided_slice %68 {offsets = [0, 24], sizes = [8, 8], strides = [1, 1]} : vector<8x32xf32> to vector<8x8xf32>
      %83 = arith.truncf %82 : vector<8x8xf32> to vector<8x8xbf16>
      %84 = vector.extract_strided_slice %69 {offsets = [24, 0], sizes = [8, 32], strides = [1, 1]} : vector<32x32xbf16> to vector<8x32xbf16>
      %cst_50 = arith.constant dense<0.000000e+00> : vector<8x32xf32>
      %85 = tpu.matmul %83, %84, %cst_50 {dimension_numbers = #tpu.dot_dimension_numbers<[0], [0], [1], [1], [0, 1, 1, 1], [], []>} : vector<8x8xbf16>, vector<8x32xbf16>, vector<8x32xf32> -> vector<8x32xf32>
      %86 = tpu.concatenate %73, %77, %81, %85 in 0 : vector<8x32xf32>, vector<8x32xf32>, vector<8x32xf32>, vector<8x32xf32> -> vector<32x32xf32>
      %87 = arith.truncf %86 : vector<32x32xf32> to vector<32x32xbf16>
      %c0_51 = arith.constant 0 : index
      %c0_52 = arith.constant 0 : index
      %c0_53 = arith.constant 0 : index
      %88 = vector.load %arg10[%c0_51, %c0_52, %c0_53] : memref<1x32x32xbf16, #tpu.memory_space<vmem>>, vector<1x32x32xbf16>
      %89 = vector.shape_cast %88 : vector<1x32x32xbf16> to vector<32x32xbf16>
      %90 = vector.shape_cast %87 : vector<32x32xbf16> to vector<1x32x32xbf16>
      tpu.vector_store %arg10[%c0_51, %c0_52, %c0_53], %90 {strides = array<i32>} : memref<1x32x32xbf16, #tpu.memory_space<vmem>>, vector<1x32x32xbf16>,
      %c0_54 = arith.constant 0 : index
      %c0_55 = arith.constant 0 : index
      %c0_56 = arith.constant 0 : index
      %91 = vector.load %arg11[%c0_54, %c0_55, %c0_56] : memref<1x1x32xf32, #tpu.memory_space<vmem>>, vector<1x1x32xf32>
      %92 = vector.shape_cast %91 : vector<1x1x32xf32> to vector<1x32xf32>
      %93 = vector.broadcast %92 : vector<1x32xf32> to vector<8x32xf32>
      %94 = arith.divf %68, %93 : vector<8x32xf32>
      %c0_57 = arith.constant 0 : index
      %c0_58 = arith.constant 0 : index
      %c0_59 = arith.constant 0 : index
      %95 = vector.load %arg9[%c0_57, %c0_58, %c0_59] : memref<1x8x32xf32, #tpu.memory_space<vmem>>, vector<1x8x32xf32>
      %96 = vector.shape_cast %95 : vector<1x8x32xf32> to vector<8x32xf32>
      %97 = vector.shape_cast %94 : vector<8x32xf32> to vector<1x8x32xf32>
      tpu.vector_store %arg9[%c0_57, %c0_58, %c0_59], %97 {strides = array<i32>} : memref<1x8x32xf32, #tpu.memory_space<vmem>>, vector<1x8x32xf32>,
    } else {
    }
    return
  }
  func.func @transform_0(%arg0: i32, %arg1: i32) -> (i32, i32, i32) {
    %c0_i32 = arith.constant 0 : i32
    %c0_i32_0 = arith.constant 0 : i32
    return %arg0, %arg1, %c0_i32 : i32, i32, i32
  }
  func.func @transform_1(%arg0: i32, %arg1: i32) -> (i32, i32, i32) {
    %c0_i32 = arith.constant 0 : i32
    %c0_i32_0 = arith.constant 0 : i32
    return %arg0, %arg1, %c0_i32 : i32, i32, i32
  }
  func.func @transform_2(%arg0: i32, %arg1: i32) -> (i32, i32) {
    %c0_i32 = arith.constant 0 : i32
    %c0_i32_0 = arith.constant 0 : i32
    %c0_i32_1 = arith.constant 0 : i32
    return %c0_i32, %c0_i32_0 : i32, i32
  }
  func.func @transform_3(%arg0: i32, %arg1: i32) -> (i32, i32) {
    %c0_i32 = arith.constant 0 : i32
    %c0_i32_0 = arith.constant 0 : i32
    %c0_i32_1 = arith.constant 0 : i32
    return %c0_i32, %c0_i32_0 : i32, i32
  }
  func.func @transform_4(%arg0: i32, %arg1: i32) -> (i32, i32) {
    %c0_i32 = arith.constant 0 : i32
    %c0_i32_0 = arith.constant 0 : i32
    %c0_i32_1 = arith.constant 0 : i32
    return %c0_i32, %c0_i32_0 : i32, i32
  }
  func.func @transform_5(%arg0: i32, %arg1: i32) -> (i32, i32) {
    %c0_i32 = arith.constant 0 : i32
    %c0_i32_0 = arith.constant 0 : i32
    %c0_i32_1 = arith.constant 0 : i32
    return %c0_i32, %c0_i32_0 : i32, i32
  }
  func.func @transform_6(%arg0: i32, %arg1: i32) -> (i32, i32) {
    %c0_i32 = arith.constant 0 : i32
    %c0_i32_0 = arith.constant 0 : i32
    %c0_i32_1 = arith.constant 0 : i32
    return %c0_i32, %c0_i32_0 : i32, i32
  }
  func.func @transform_7(%arg0: i32, %arg1: i32) -> (i32, i32, i32) {
    %c0_i32 = arith.constant 0 : i32
    %c0_i32_0 = arith.constant 0 : i32
    %c0_i32_1 = arith.constant 0 : i32
    return %arg0, %c0_i32, %c0_i32_0 : i32, i32, i32
  }
  func.func @transform_8(%arg0: i32, %arg1: i32) -> (i32, i32, i32) {
    %c0_i32 = arith.constant 0 : i32
    %c0_i32_0 = arith.constant 0 : i32
    %c0_i32_1 = arith.constant 0 : i32
    return %arg0, %c0_i32, %c0_i32_0 : i32, i32, i32
  }
  func.func @transform_9(%arg0: i32, %arg1: i32) -> (i32, i32, i32) {
    %c0_i32 = arith.constant 0 : i32
    %c0_i32_0 = arith.constant 0 : i32
    %c0_i32_1 = arith.constant 0 : i32
    return %arg0, %c0_i32, %c0_i32_0 : i32, i32, i32
  }
}

module attributes {stable_mosaic.version = 11 : i64} {
  func.func @_q_pass_kernel(%arg0: i32, %arg1: i32, %arg2: memref<1x32x32xf32, #tpu.memory_space<vmem>>, %arg3: memref<32x32xbf16, #tpu.memory_space<vmem>>, %arg4: memref<1x32xf32, #tpu.memory_space<vmem>>, %arg5: memref<32x4xf32, #tpu.memory_space<vmem>>, %arg6: memref<4x32xf32, #tpu.memory_space<vmem>>, %arg7: memref<1x1x32xf32, #tpu.memory_space<vmem>>, %arg8: memref<1x32x32xbf16, #tpu.memory_space<vmem>>, %arg9: memref<1x32xf32, #tpu.memory_space<vmem>>, %arg10: memref<1x32x32xf32, #tpu.memory_space<vmem>>) attributes {dimension_semantics = [#tpu.dimension_semantics<parallel>, #tpu.dimension_semantics<parallel>], iteration_bounds = array<i64: 2, 1>, scalar_prefetch = 0 : i64, scratch_operands = 0 : i64, tpu.core_type = #tpu.core_type<tc>, window_params = [{transform_indices = @transform_0, window_bounds = array<i64: 1, 32, 32>}, {pipeline_mode = #tpu.pipeline_mode<synchronous>, transform_indices = @transform_1, window_bounds = array<i64: 32, 32>}, {pipeline_mode = #tpu.pipeline_mode<synchronous>, transform_indices = @transform_2, window_bounds = array<i64: 1, 32>}, {pipeline_mode = #tpu.pipeline_mode<synchronous>, transform_indices = @transform_3, window_bounds = array<i64: 32, 4>}, {pipeline_mode = #tpu.pipeline_mode<synchronous>, transform_indices = @transform_4, window_bounds = array<i64: 4, 32>}, {transform_indices = @transform_5, window_bounds = array<i64: 1, 1, 32>}, {transform_indices = @transform_6, window_bounds = array<i64: 1, 32, 32>}, {pipeline_mode = #tpu.pipeline_mode<synchronous>, transform_indices = @transform_7, window_bounds = array<i64: 1, 32>}, {transform_indices = @transform_8, window_bounds = array<i64: 1, 32, 32>}]} {
    %c0 = arith.constant 0 : index
    %c0_0 = arith.constant 0 : index
    %c0_1 = arith.constant 0 : index
    %0 = vector.load %arg2[%c0, %c0_0, %c0_1] : memref<1x32x32xf32, #tpu.memory_space<vmem>>, vector<1x32x32xf32>
    %1 = vector.shape_cast %0 : vector<1x32x32xf32> to vector<32x32xf32>
    %2 = arith.truncf %1 : vector<32x32xf32> to vector<32x32xbf16>
    %c0_2 = arith.constant 0 : index
    %c0_3 = arith.constant 0 : index
    %3 = vector.load %arg3[%c0_2, %c0_3] : memref<32x32xbf16, #tpu.memory_space<vmem>>, vector<32x32xbf16>
    %cst = arith.constant dense<0.000000e+00> : vector<32x32xf32>
    %4 = tpu.matmul %2, %3, %cst {dimension_numbers = #tpu.dot_dimension_numbers<[1], [0], [0], [1], [0, 0, 1, 1], [], []>} : vector<32x32xbf16>, vector<32x32xbf16>, vector<32x32xf32> -> vector<32x32xf32>
    %c0_4 = arith.constant 0 : index
    %c0_5 = arith.constant 0 : index
    %5 = vector.load %arg4[%c0_4, %c0_5] : memref<1x32xf32, #tpu.memory_space<vmem>>, vector<1x32xf32>
    %6 = vector.broadcast %5 : vector<1x32xf32> to vector<32x32xf32>
    %7 = arith.addf %4, %6 : vector<32x32xf32>
    %cst_6 = arith.constant 0.594603539 : f32
    %8 = vector.broadcast %cst_6 : f32 to vector<32x32xf32>
    %9 = arith.mulf %7, %8 : vector<32x32xf32>
    %cst_7 = arith.constant dense<0xFF800000> : vector<32xf32>
    %10 = vector.multi_reduction <maximumf>, %9, %cst_7 [1] : vector<32x32xf32> to vector<32xf32>
    %11 = vector.shape_cast %10 : vector<32xf32> to vector<32x1xf32>
    %12 = vector.broadcast %11 : vector<32x1xf32> to vector<32x32xf32>
    %13 = arith.subf %9, %12 : vector<32x32xf32>
    %14 = math.exp %13 : vector<32x32xf32>
    %c0_8 = arith.constant 0 : index
    %c0_9 = arith.constant 0 : index
    %15 = vector.load %arg5[%c0_8, %c0_9] : memref<32x4xf32, #tpu.memory_space<vmem>>, vector<32x4xf32>
    %cst_10 = arith.constant dense<0.000000e+00> : vector<32x4xf32>
    %16 = tpu.matmul %14, %15, %cst_10 {dimension_numbers = #tpu.dot_dimension_numbers<[1], [0], [0], [1], [0, 0, 1, 1], [], []>} : vector<32x32xf32>, vector<32x4xf32>, vector<32x4xf32> -> vector<32x4xf32>
    %c0_11 = arith.constant 0 : index
    %c0_12 = arith.constant 0 : index
    %17 = vector.load %arg6[%c0_11, %c0_12] : memref<4x32xf32, #tpu.memory_space<vmem>>, vector<4x32xf32>
    %cst_13 = arith.constant dense<0.000000e+00> : vector<32x32xf32>
    %18 = tpu.matmul %16, %17, %cst_13 {dimension_numbers = #tpu.dot_dimension_numbers<[1], [0], [0], [1], [0, 0, 1, 1], [], []>} : vector<32x4xf32>, vector<4x32xf32>, vector<32x32xf32> -> vector<32x32xf32>
    %c0_14 = arith.constant 0 : index
    %c0_15 = arith.constant 0 : index
    %c0_16 = arith.constant 0 : index
    %19 = vector.load %arg7[%c0_14, %c0_15, %c0_16] : memref<1x1x32xf32, #tpu.memory_space<vmem>>, vector<1x1x32xf32>
    %20 = vector.shape_cast %19 : vector<1x1x32xf32> to vector<1x32xf32>
    %21 = vector.broadcast %20 : vector<1x32xf32> to vector<32x32xf32>
    %22 = arith.mulf %18, %21 : vector<32x32xf32>
    %cst_17 = arith.constant 1.000000e-30 : f32
    %23 = vector.broadcast %cst_17 : f32 to vector<32x32xf32>
    %24 = arith.maximumf %22, %23 : vector<32x32xf32>
    %25 = tpu.reciprocal %24 {approx = true} : vector<32x32xf32> -> vector<32x32xf32>
    %26 = arith.mulf %14, %25 : vector<32x32xf32>
    %27 = arith.truncf %26 : vector<32x32xf32> to vector<32x32xbf16>
    %c0_18 = arith.constant 0 : index
    %c0_19 = arith.constant 0 : index
    %c0_20 = arith.constant 0 : index
    %28 = vector.load %arg8[%c0_18, %c0_19, %c0_20] : memref<1x32x32xbf16, #tpu.memory_space<vmem>>, vector<1x32x32xbf16>
    %29 = vector.shape_cast %28 : vector<1x32x32xbf16> to vector<32x32xbf16>
    %cst_21 = arith.constant dense<0.000000e+00> : vector<32x32xf32>
    %30 = tpu.matmul %27, %29, %cst_21 {dimension_numbers = #tpu.dot_dimension_numbers<[1], [0], [0], [1], [0, 0, 1, 1], [], []>} : vector<32x32xbf16>, vector<32x32xbf16>, vector<32x32xf32> -> vector<32x32xf32>
    %c0_22 = arith.constant 0 : index
    %c0_23 = arith.constant 0 : index
    %31 = vector.load %arg9[%c0_22, %c0_23] : memref<1x32xf32, #tpu.memory_space<vmem>>, vector<1x32xf32>
    %32 = vector.broadcast %31 : vector<1x32xf32> to vector<32x32xf32>
    %33 = arith.addf %30, %32 : vector<32x32xf32>
    %c0_24 = arith.constant 0 : index
    %c0_25 = arith.constant 0 : index
    %c0_26 = arith.constant 0 : index
    %34 = vector.load %arg10[%c0_24, %c0_25, %c0_26] : memref<1x32x32xf32, #tpu.memory_space<vmem>>, vector<1x32x32xf32>
    %35 = vector.shape_cast %34 : vector<1x32x32xf32> to vector<32x32xf32>
    %36 = vector.shape_cast %33 : vector<32x32xf32> to vector<1x32x32xf32>
    tpu.vector_store %arg10[%c0_24, %c0_25, %c0_26], %36 {strides = array<i32>} : memref<1x32x32xf32, #tpu.memory_space<vmem>>, vector<1x32x32xf32>,
    return
  }
  func.func @transform_0(%arg0: i32, %arg1: i32) -> (i32, i32, i32) {
    %c0_i32 = arith.constant 0 : i32
    %c0_i32_0 = arith.constant 0 : i32
    return %arg0, %arg1, %c0_i32 : i32, i32, i32
  }
  func.func @transform_1(%arg0: i32, %arg1: i32) -> (i32, i32) {
    %c0_i32 = arith.constant 0 : i32
    %c0_i32_0 = arith.constant 0 : i32
    %c0_i32_1 = arith.constant 0 : i32
    return %c0_i32, %c0_i32_0 : i32, i32
  }
  func.func @transform_2(%arg0: i32, %arg1: i32) -> (i32, i32) {
    %c0_i32 = arith.constant 0 : i32
    %c0_i32_0 = arith.constant 0 : i32
    %c0_i32_1 = arith.constant 0 : i32
    return %c0_i32, %c0_i32_0 : i32, i32
  }
  func.func @transform_3(%arg0: i32, %arg1: i32) -> (i32, i32) {
    %c0_i32 = arith.constant 0 : i32
    %c0_i32_0 = arith.constant 0 : i32
    %c0_i32_1 = arith.constant 0 : i32
    return %c0_i32, %c0_i32_0 : i32, i32
  }
  func.func @transform_4(%arg0: i32, %arg1: i32) -> (i32, i32) {
    %c0_i32 = arith.constant 0 : i32
    %c0_i32_0 = arith.constant 0 : i32
    %c0_i32_1 = arith.constant 0 : i32
    return %c0_i32, %c0_i32_0 : i32, i32
  }
  func.func @transform_5(%arg0: i32, %arg1: i32) -> (i32, i32, i32) {
    %c0_i32 = arith.constant 0 : i32
    %c0_i32_0 = arith.constant 0 : i32
    %c0_i32_1 = arith.constant 0 : i32
    return %arg0, %c0_i32, %c0_i32_0 : i32, i32, i32
  }
  func.func @transform_6(%arg0: i32, %arg1: i32) -> (i32, i32, i32) {
    %c0_i32 = arith.constant 0 : i32
    %c0_i32_0 = arith.constant 0 : i32
    %c0_i32_1 = arith.constant 0 : i32
    return %arg0, %c0_i32, %c0_i32_0 : i32, i32, i32
  }
  func.func @transform_7(%arg0: i32, %arg1: i32) -> (i32, i32) {
    %c0_i32 = arith.constant 0 : i32
    %c0_i32_0 = arith.constant 0 : i32
    %c0_i32_1 = arith.constant 0 : i32
    return %c0_i32, %c0_i32_0 : i32, i32
  }
  func.func @transform_8(%arg0: i32, %arg1: i32) -> (i32, i32, i32) {
    %c0_i32 = arith.constant 0 : i32
    %c0_i32_0 = arith.constant 0 : i32
    return %arg0, %arg1, %c0_i32 : i32, i32, i32
  }
}

</mosaic_0001>

<bundles_post_ra>
// kernel: multi_head_linear_attention_forward.3
= control target key start
LH: loop header
LB: loop body
LE: loop exit
PB: predicated region body
PF: predicated region fallthrough
CT: control target
= control target key end

     0   :  { %13 = vsyncpa [#allocation3], 0  ;;  %s1389_s0 = inlined_call_operand.vmem [shape: f32[2,32,32], index: 0, kind: input, shape index: {}]   ;;  %s1390_s1 = inlined_call_operand.vmem [shape: bf16[32,32], index: 1, kind: input, shape index: {}]   ;;  %s1391_s2 = inlined_call_operand.vmem [shape: f32[1,32], index: 2, kind: input, shape index: {}]   ;;  %s1392_s3 = inlined_call_operand.vmem [shape: f32[32,4], index: 3, kind: input, shape index: {}]   ;;  %s1393_s4 = inlined_call_operand.vmem [shape: f32[4,32], index: 4, kind: input, shape index: {}]   ;;  %s1394_s5 = inlined_call_operand.vmem [shape: f32[2,1,32], index: 5, kind: input, shape index: {}]   ;;  %s1395_s6 = inlined_call_operand.vmem [shape: bf16[2,32,32], index: 6, kind: input, shape index: {}]   ;;  %s1396_s7 = inlined_call_operand.vmem [shape: f32[1,32], index: 7, kind: input, shape index: {}]   ;;  %s1397_s8 = inlined_call_operand.hbm [shape: f32[2,32,32], index: 8, kind: output, shape index: {}]  }
   0x1   :  { %15 = vsyncpa [#allocation3 + $0x1], 0  ;;  %s1220_s27 = smov 0   ;;  %s1222_s28 = smov 0  }
   0x2   :  { %s1224_s29 = smov 0   ;;  %s1226_s30 = smov 0  }
   0x3   :  { %s1228_s9 = smov 0   ;;  %s1230_s10 = smov 0  }
   0x4 LB: > { %s910_s11 = sadd.s32 4294967295, %s1170_s10   ;;  %s911_s12 = sadd.s32 4294967294, %s1170_s10   ;;  %s1170_s10 = sphi %s1230_s10, %s21_s10   ;;  %s1166_s9 = sphi %s1228_s9, %s1404_s9   ;;  %s1162_s30 = sphi %s1226_s30, %s1403_s30   ;;  %s1158_s29 = sphi %s1224_s29, %s1402_s29   ;;  %s1154_s28 = sphi %s1222_s28, %s1401_s28   ;;  %s1150_s27 = sphi %s1220_s27, %s1400_s27  }
   0x5   : > { %s33_s13 = sadd.s32 1, %s1166_s9  ;;  %s227_s14 = sadd.s32 1, %s1158_s29 }
   0x6   : > { %p35_p0 = scmp.ge.s32.totalorder %s33_s13, 2  ;;  %p237_p1 = scmp.ne.s32.totalorder %s1158_s29, %s1154_s28 }
   0x7   : > { %p238_p2 = scmp.eq.s32.totalorder %s910_s11, 1  ;;  %p243_p3 = scmp.ne.s32.totalorder %s1154_s28, %s1150_s27 }
   0x8   : > { %s1406_s13 = smov (%p35_p0, %s33_s13), 0  ;;  %p244_p5 = scmp.eq.s32.totalorder %s911_s12, 1 }
   0x9   : > { %p1260_p4 = por %p238_p2, %p237_p1  ;;  %s222_s16 = ssub.s32 %s1166_s9, %s1406_s13 }
   0xa   : > { %p914_p6 = scmp.ge.s32.totalorder %s1170_s10, 1  ;;  %p225_p7 = scmp.eq.s32.totalorder %s222_s16, 0 }
   0xb   : > { %p1267_p8 = por %p244_p5, %p243_p3  ;;  %p304_p9 = scmp.lt.s32.totalorder %s1170_s10, 3 }
   0xc   : > { %s1273_s18 = scalar_select %p225_p7, %s1158_s29, %s227_s14  }
   0xd   : > { %p305_p10 = pnand %p914_p6, %p304_p9 }
   0xe   : > { %v1072_v0 = vld [vmem:[%s1390_s1] sm:$0xff] (!%p305_p10)   ;;  %p351_p11 = scmp.lt.s32.totalorder (!%p305_p10), %s1162_s30, 1  ;;  %v1073_v1 = vld [vmem:[%s1390_s1 + $0x8] sm:$0xff] (!%p305_p10)   ;;  %vm399_vm0 = vcmask (!%p305_p10), 261120   ;;  %v485_v27 = vld [vmem:[%s1392_s3 + $0x10] sm:$0xff] (!%p305_p10)  ;;  %vm598_vm1 = vcmask (!%p305_p10), 1043456  }
   0xf   : > { %308 = sbr.rel (%p305_p10) target bundleno = 1091 (0x443), region = 52  ;;  %969 = vmatprep.subr.bf16.mxu0 (!%p305_p10), %v1072_v0  ;;  %v920_v8 = vld [vmem:[%s1391_s2] ss:$0 sm:$0xff] (!%p305_p10)  ;;  %v484_v26 = vld [vmem:[%s1392_s3 + $0x8] sm:$0xff] (!%p305_p10)  ;;  %v486_v29 = vld [vmem:[%s1392_s3 + $0x18] sm:$0xff] (!%p305_p10)  ;;  %vm585_vm2 = vcmask (!%p305_p10), 31744  }
  0x10   : > { %970 = vmatpush3.bf16.msra.mxu0 (!%p305_p10), %v1072_v0  ;;  %v483_v25 = vld [vmem:[%s1392_s3] sm:$0xff] (!%p305_p10)  ;;  %v1011_v30 = vpack.c.bf16 (!%p305_p10), %v486_v29, %v485_v27  ;;  %s947_s16 = sshll.u32 (!%p305_p10), %s1162_s30, 9 }
  0x11   : > { %971 = vmatprep.subr.bf16.mxu0 (!%p305_p10), %v1073_v1  ;;  %v1007_v28 = vpack.c.bf16 (!%p305_p10), %v484_v26, %v483_v25  ;;  %v584_v31 = vld [vmem:[%s1393_s4] sm:$0xf] (!%p305_p10)  ;;  %s1338_s21 = scalar_lea.hbm (!%p305_p10), %s1397_s8, %s947_s16 }
  0x13   : > { %1008 = vmatprep.subr.bf16.mxu1 (!%p305_p10), %v1007_v28 }
  0x14   : > { %972 = vmatpush3.bf16.msra.mxu0 (!%p305_p10), %v1073_v1  ;;  %1010 = vmatpush3.bf16.msra.mxu1 (!%p305_p10), %v1007_v28 }
  0x15   : > { %1012 = vmatprep.subr.bf16.mxu1 (!%p305_p10), %v1011_v30  ;;  %991 = vmatprep.subr.msk.mxu0 (!%p305_p10), %vm598_vm1, %v584_v31 }
  0x16   : > { %s1283_s23 = scalar_select %p351_p11, %s1162_s30, 1 }
  0x18   : > { %s945_s24 = sshll.u32 %s1283_s23, 5  ;;  %1014 = vmatpush3.bf16.msra.mxu1 %v1011_v30  ;;  %s946_s14 = sshll.u32 %s1283_s23, 4 }
  0x19   : > { %s358_s11 = scalar_lea.vmem %s1389_s0, %s945_s24  ;;  %s367_s20 = scalar_lea.vmem %s1395_s6, %s946_s14 }
  0x1a   : > { %v370_v2 = vld [vmem:[%s358_s11] sm:$0xff]  ;;  %v371_v3 = vld [vmem:[%s358_s11 + $0x8] sm:$0xff]  ;;  %v372_v4 = vld [vmem:[%s358_s11 + $0x10] sm:$0xff]  ;;  %s362_s24 = scalar_lea.vmem %s1394_s5, %s1283_s23  ;;  %s347_s23 = sand.u32 1, %s1154_s28  }
  0x1b   : > { %v374_v5 = vpack.c.bf16 %v371_v3, %v370_v2  ;;  %v373_v6 = vld [vmem:[%s358_s11 + $0x18] sm:$0xff]  ;;  %v1074_v52 = vld [vmem:[%s367_s20] sm:$0xff]   ;;  %v1075_v53 = vld [vmem:[%s367_s20 + $0x8] sm:$0xff]   ;;  %s915_s25 = sshll.u32 %s347_s23, 5  ;;  %s1343_s30 = scalar_lea.sflag [#allocation3], %s347_s23 }
  0x1c   : > { %v375_v7 = vpack.c.bf16 %v373_v6, %v372_v4  ;;  %999 = vmatprep.subr.bf16.mxu1 %v1074_v52  ;;  %v934_v54 = vld [vmem:[%s362_s24] ss:$0 sm:$0xff]  ;;  %s349_s12 = scalar_lea.vmem [#allocation2], %s915_s25  ;;  %s1172_s24 = smov [#allocation2]  }
  0x1d   : > { %973 = vmatprep.mubr.msk.bf16.mxu0 %vm399_vm0, %v374_v5  ;;  %s810_s14 = sshll.u32 %s349_s12, 4  ;;  %s1096_s25 = sshll.u32 %s1172_s24, 4  ;;  %s1333_s14 = int_to_ptr.vmem [resolvable:$true] %s810_s14  ;;  %s1097_s25 = int_to_ptr.vmem [resolvable:$false] %s1096_s25 }
  0x1e   : > { %974 = vmatmul.mubr.msk.bf16.vlgmr.msra.gmra.mrb[0].mxu0 %vm399_vm0, %v375_v7  ;;  %s1092_s22 = scalar_lea.vmem %s1333_s14, 512  ;;  %s1098_s26 = scalar_lea.vmem %s1097_s25, 1024 }
  0x1f   : > { %992 = vmatpush3.msk.msra.mxu0 %vm598_vm1, %v584_v31  ;;  %p1093_p12 = scmp.ne.s32.totalorder %s1333_s14, %s1092_s22  ;;  %p1099_p1 = scmp.lt.s32.totalorder %s1333_s14, %s1097_s25 }
  0x20   : > { %p1100_p2 = scmp.lt.s32.totalorder %s1098_s26, %s1092_s22 }
  0x21   : > { %p1094_p13 = pnand %p1093_p12, %p1260_p4 }
  0x22   : > { %p1101_p3 = por %p1100_p2, %p1099_p1 }
  0x23   : > { %p1095_p0 = pneg %p1094_p13 }
  0x25   : > { %p1102_p5 = pnand %p1101_p3, %p1095_p0 }
  0xf1   : > { %v975_v9 = vpop.f32.mrb[0].mxu0 }
  0xf2   : > { %v449_v10 = vadd.f32 %v975_v9, %v920_v8  ;;  %v440_v11 = vpop.f32.mrb[1].mxu0 }
  0xf3   : > { %v441_v12 = vadd.f32 %v920_v8, %v440_v11  ;;  %v976_v13 = vpop.f32.mrb[2].mxu0 }
  0xf4   : > { %v457_v14 = vmul.f32 0.59460354, %v449_v10  ;;  %v452_v15 = vadd.f32 %v976_v13, %v920_v8  ;;  %v443_v16 = vpop.f32.mrb[3].mxu0  ;;  %v935_v13 = vld [vmem:[%s1396_s7] ss:$0 sm:$0xff] }
  0xf5   : > { %v455_v17 = vmul.f32 0.59460354, %v441_v12  ;;  %v444_v18 = vadd.f32 %v920_v8, %v443_v16 }
  0xf6   : > { %v458_v19 = vmul.f32 0.59460354, %v452_v15  ;;  %v465_v20 = vsel %vm399_vm0, %v457_v14, -inf }
  0xf7   : > { %v456_v21 = vmul.f32 0.59460354, %v444_v18  ;;  %466 = vmax.xlane.f32.xlu1 %v465_v20  ;;  %v459_v22 = vsel %vm399_vm0, %v455_v17, -inf }
  0xf8   : > { %460 = vmax.xlane.f32.xlu0 %v459_v22  ;;  %v468_v23 = vsel %vm399_vm0, %v458_v19, -inf }
  0xf9   : > { %v462_v24 = vsel %vm399_vm0, %v456_v21, -inf }
  0xfb   : > { %469 = vmax.xlane.f32.xlu1 %v468_v23 }
  0xfc   : > { %463 = vmax.xlane.f32.xlu0 %v462_v24 }
 0x184   : > { %v467_v32 = vpop.xlane.xlu1 %466 }
 0x185   : > { %v461_v33 = vpop.xlane.xlu0 %460  ;;  %v473_v35 = vsub.f32 %v457_v14, %v467_v32 }
 0x186   : > { %v471_v34 = vsub.f32 %v455_v17, %v461_v33 }
 0x187   : > { %v479_v41 = vmul.f32 1.442695, %v473_v35 }
 0x188   : > { %v475_v36 = vmul.f32 1.442695, %v471_v34  ;;  %v470_v37 = vpop.xlane.xlu1 %469 }
 0x189   : > { %v464_v38 = vpop.xlane.xlu0 %463  ;;  %v474_v39 = vsub.f32 %v458_v19, %v470_v37 }
 0x18a   : > { %1076 = vpow2.f32 %v475_v36  ;;  %v472_v40 = vsub.f32 %v456_v21, %v464_v38 }
 0x18b   : > { %v481_v43 = vmul.f32 1.442695, %v474_v39 }
 0x18c   : > { %v477_v42 = vmul.f32 1.442695, %v472_v40 }
 0x18e   : > { %1078 = vpow2.f32 %v477_v42 }
 0x18f   : > { %1080 = vpow2.f32 %v479_v41 }
 0x190   : > { %1082 = vpow2.f32 %v481_v43 }
 0x194   : > { %v1077_v44 = vpop.eup %1076 }
 0x195   : > { %985 = vmatprep.mubr.msk.f32.mxu1 %vm399_vm0, %v1077_v44 }
 0x198   : > { %v1079_v45 = vpop.eup %1078 }
 0x199   : > { %v1081_v46 = vpop.eup %1080  ;;  %986 = vmatmul.mubr.msk.f32.vlgmr.msra.gmra.mrb[0].mxu1 %vm399_vm0, %v1079_v45 }
 0x19a   : > { %988 = vmatprep.mubr.msk.f32.mxu1 %vm399_vm0, %v1081_v46  ;;  %v1083_v47 = vpop.eup %1082  ;;  %1000 = vmatpush3.bf16.msra.mxu1 %v1074_v52 }
 0x19b   : > { %1001 = vmatprep.subr.bf16.mxu1 %v1075_v53 }
 0x19d   : > { %989 = vmatmul.mubr.msk.f32.gmra.mrb[2].mxu1 %vm399_vm0, %v1083_v47 }
 0x19e   : > { %1002 = vmatpush3.bf16.msra.mxu1 %v1075_v53 }
 0x26c   : > { %v987_v48 = vpop.f32.mrb[0].mxu1 }
 0x26d   : > { %v565_v49 = vpop.f32.mrb[1].mxu1 }
 0x26e   : > { %993 = vmatprep.mubr.msk.f32.mxu0 %vm585_vm2, %v565_v49 }
 0x26f   : > { %994 = vmatmul.mubr.msk.f32.vlgmr.msra.gmra.mrb[4].mxu0 %vm585_vm2, %v987_v48 }
 0x270   : > { %v990_v50 = vpop.f32.mrb[2].mxu1 }
 0x271   : > { %v575_v51 = vpop.f32.mrb[3].mxu1 }
 0x272   : > { %996 = vmatprep.mubr.msk.f32.mxu0 %vm585_vm2, %v575_v51 }
 0x273   : > { %997 = vmatmul.mubr.msk.f32.gmra.mrb[6].mxu0 %vm585_vm2, %v990_v50 }
 0x342   : > { %v995_v55 = vpop.f32.mrb[4].mxu0 }
 0x343   : > { %v695_v56 = vmul.f32 %v995_v55, %v934_v54  ;;  %v668_v57 = vpop.f32.mrb[5].mxu0 }
 0x344   : > { %v694_v58 = vmul.f32 %v934_v54, %v668_v57 }
 0x345   : > { %v699_v59 = vmax.f32 %v695_v56, 1e-30 }
 0x346   : > { %v698_v60 = vmax.f32 %v694_v58, 1e-30  ;;  %v998_v61 = vpop.f32.mrb[6].mxu0 }
 0x347   : > { %1084 = vrcp.f32 %v699_v59  ;;  %v697_v62 = vmul.f32 %v998_v61, %v934_v54  ;;  %v678_v63 = vpop.f32.mrb[7].mxu0 }
 0x348   : > { %1086 = vrcp.f32 %v698_v60  ;;  %v696_v0 = vmul.f32 %v934_v54, %v678_v63 }
 0x349   : > { %v701_v1 = vmax.f32 %v697_v62, 1e-30 }
 0x34a   : > { %v700_v2 = vmax.f32 %v696_v0, 1e-30 }
 0x34b   : > { %1088 = vrcp.f32 %v701_v1 }
 0x34c   : > { %1090 = vrcp.f32 %v700_v2 }
 0x351   : > { %v1085_v3 = vpop.eup %1084 }
 0x352   : > { %v1087_v4 = vpop.eup %1086  ;;  %v707_v5 = vmul.f32 %v1085_v3, %v1079_v45 }
 0x353   : > { %v706_v6 = vmul.f32 %v1087_v4, %v1077_v44 }
 0x355   : > { %v1089_v7 = vpop.eup %1088  ;;  %v710_v8 = vpack.c.bf16 %v707_v5, %v706_v6 }
 0x356   : > { %v1091_v9 = vpop.eup %1090  ;;  %v709_v10 = vmul.f32 %v1089_v7, %v1083_v47 }
 0x357   : > { %v708_v11 = vmul.f32 %v1091_v9, %v1081_v46  ;;  %1003 = vmatprep.mubr.msk.bf16.mxu1 %vm399_vm0, %v710_v8 }
 0x359   : > { %v711_v12 = vpack.c.bf16 %v709_v10, %v708_v11 }
 0x35b   : > { %1004 = vmatmul.mubr.msk.bf16.vlgmr.msra.gmra.mrb[4].mxu1 %vm399_vm0, %v711_v12 }
 0x42e   : > { %v1005_v14 = vpop.f32.mrb[4].mxu1 }
 0x42f   : > { %v784_v15 = vadd.f32 %v1005_v14, %v935_v13  ;;  %v775_v16 = vpop.f32.mrb[5].mxu1 }
 0x430   : > { %v776_v17 = vadd.f32 %v935_v13, %v775_v16  ;;  %v1006_v18 = vpop.f32.mrb[6].mxu1 }
 0x431   : > { %792 = vst.msk [vmem:[%s349_s12 + $0x10] sm:$0xff] %vm399_vm0, %v784_v15  ;;  %v787_v19 = vadd.f32 %v1006_v18, %v935_v13  ;;  %v778_v20 = vpop.f32.mrb[7].mxu1 }
 0x432   : > { %790 = vst.msk [vmem:[%s349_s12] sm:$0xff] %vm399_vm0, %v776_v17  ;;  %v779_v21 = vadd.f32 %v935_v13, %v778_v20 }
 0x433   : > { %793 = vst.msk [vmem:[%s349_s12 + $0x18] sm:$0xff] %vm399_vm0, %v787_v19 }
 0x434   : > { %791 = vst.msk [vmem:[%s349_s12 + $0x8] sm:$0xff] %vm399_vm0, %v779_v21 }
 0x435   : > { %1105 = shalt.err (!%p1102_p5)
}
 0x436   : > { %s1106_s23 = scalar_lea.hbm %s1338_s21, 512  ;;  %s1110_s16 = scalar_lea.hbm %s1397_s8, 1024 }
 0x437   : > { %p1107_p6 = scmp.ne.s32.totalorder %s1338_s21, %s1106_s23  ;;  %p1111_p10 = scmp.lt.u32.totalorder %s1338_s21, %s1397_s8 }
 0x438   : > { %p1112_p11 = scmp.lt.u32.totalorder %s1110_s16, %s1106_s23  ;;  %p1114_p13 = scmp.lt.u32.totalorder %s1106_s23, %s1338_s21 }
 0x439   : > { %p1108_p7 = pnand %p1107_p6, %p1260_p4 }
 0x43a   : > { %p1113_p12 = por %p1112_p11, %p1111_p10 }
 0x43b   : > { %p1109_p9 = pneg %p1108_p7 }
 0x43c   : > { %p1115_p0 = por %p1114_p13, %p1113_p12 }
 0x43e   : > { %p1116_p1 = pnand %p1115_p0, %p1109_p9 }
 0x440   : > { %1119 = shalt.err (!%p1116_p1)
}
 0x441   : > { %s1173_s22 = smov 128   ;;  %s1174_s24 = smov 8  }
 0x442   : > { %1015 = dma.vmem_to_hbm [thread:$0]  (%p1260_p4), %s1333_s14, 512, %s1338_s21, %s1343_s30, %s1173_s22, %s1173_s22, %s1174_s24  }
 0x443 PF: > { %p1021_p2 = scmp.ge.s32.totalorder %s1170_s10, 2  ;;  %s825_s25 = sand.u32 1, %s1150_s27  }
 0x444   : > { %s826_s26 = scalar_lea.sflag [#allocation3], %s825_s25 }
 0x445   : > { %p1018_p3 = pnand %p1021_p2, %p1267_p8 }
 0x447   : > { %1145 = dma.done.wait (!%p1018_p3), %s826_s26, 512  }
 0x448   : > { %1147 = vsyncadd (!%p1018_p3), %s826_s26, 4294966784  ;;  %s21_s10 = sadd.s32 1, %s1170_s10   ;;  %s1400_s27 = smov %s1154_s28 }
 0x449   : > { %p18_p5 = scmp.ge.s32.totalorder %s21_s10, 4   ;;  %s1401_s28 = smov %s1158_s29 }
 0x44a   : > { %s1402_s29 = smov %s1273_s18  ;;  %s1403_s30 = smov %s1166_s9 }
 0x44b   : > { %s1404_s9 = smov %s1406_s13  ;;  %20 = sbr.rel (!%p18_p5) target bundleno = 4 (0x4), region = 93 }
 0x452   :  { %831 = vsyncpa [#allocation3], 1 }
 0x453   :  { %833 = vsyncpa [#allocation3 + $0x1], 1 }

// kernel: multi_head_linear_attention_forward.2
= control target key start
LH: loop header
LB: loop body
LE: loop exit
PB: predicated region body
PF: predicated region fallthrough
CT: control target
= control target key end

     0   :  { %s2362_s0 = inlined_call_operand.vmem [shape: f32[2,32,32], index: 0, kind: input, shape index: {}]   ;;  %s2363_s1 = inlined_call_operand.hbm [shape: f32[2,32,32], index: 1, kind: input, shape index: {}]   ;;  %s2364_s2 = inlined_call_operand.hbm [shape: bf16[32,32], index: 2, kind: input, shape index: {}]   ;;  %s2365_s3 = inlined_call_operand.hbm [shape: bf16[32,32], index: 3, kind: input, shape index: {}]   ;;  %s2366_s4 = inlined_call_operand.vmem [shape: f32[1,32], index: 4, kind: input, shape index: {}]   ;;  %s2367_s5 = inlined_call_operand.vmem [shape: f32[1,32], index: 5, kind: input, shape index: {}]   ;;  %s2368_s6 = inlined_call_operand.hbm [shape: bf16[32,32], index: 6, kind: input, shape index: {}]   ;;  %s2369_s7 = inlined_call_operand.vmem [shape: f32[2,8,32], index: 7, kind: output, shape index: {0}]   ;;  %s2370_s8 = inlined_call_operand.vmem [shape: bf16[2,32,32], index: 8, kind: output, shape index: {1}]   ;;  %s2371_s9 = inlined_call_operand.vmem [shape: f32[2,1,32], index: 9, kind: output, shape index: {2}]  }
   0x1   :  { %2376 = sst [smem:[#allocation13_spill]] %s2366_s4 }
   0x2   :  { %2377 = sst [smem:[#allocation14_spill]] %s2367_s5 }
   0x3   :  { %2378 = sst [smem:[#allocation15_spill]] %s2370_s8 }
   0x4   :  { %15 = vsyncpa [#allocation4], 0 }
   0x5   :  { %17 = vsyncpa [#allocation4 + $0x1], 0 }
   0x6   :  { %18 = vsyncpa [#allocation6], 0 }
   0x7   :  { %19 = vsyncpa [#allocation9], 0  ;;  %s2004_s30 = smov 0   ;;  %s2006_s10 = smov 0  }
   0x8   :  { %s2008_s11 = smov 0   ;;  %s2010_s12 = smov 0  }
   0x9   :  { %s2012_s13 = smov 0   ;;  %s2014_s14 = smov 0  }
   0xa LB: > { %s1495_s15 = sadd.s32 4294967295, %s1935_s14   ;;  %p87_p0 = scmp.ne.s32.totalorder %s1919_s10, %s1915_s30  ;;  %s1935_s14 = sphi %s2014_s14, %s25_s14   ;;  %s1931_s13 = sphi %s2012_s13, %s2395_s13   ;;  %s1927_s12 = sphi %s2010_s12, %s2394_s12   ;;  %s1923_s11 = sphi %s2008_s11, %s2393_s11   ;;  %s1919_s10 = sphi %s2006_s10, %s2392_s10   ;;  %s1915_s30 = sphi %s2004_s30, %s2391_s30  }
   0xb   : > { %p2034_p1 = scmp.eq.s32.totalorder %s1495_s15, 0  ;;  %p1497_p2 = scmp.ge.s32.totalorder %s1935_s14, 1 }
   0xc   : > { %p281_p3 = scmp.lt.s32.totalorder %s1935_s14, 3  ;;  %s1937_s19 = smov [#allocation5]  }
   0xd   : > { %s2379_s16 = scalar_select %p2034_p1, 1, 0 }
   0xe   : > { %p2042_p4 = por %p2034_p1, %p87_p0  ;;  %p2046_p5 = pnand %p1497_p2, %p281_p3 }
   0xf   : > { %s293_s20 = sshll.u32 %s1937_s19, 4  ;;  %s1938_s22 = smov [#allocation7]   ;;  %s2050_s20 = int_to_ptr.vmem [resolvable:$true] %s293_s20 }
  0x10   : > { %s2380_s17 = scalar_select %p2042_p4, 1, 0 }
  0x11   : > { %s2381_s18 = scalar_select %p2046_p5, 1, 0 }
  0x12   : > { %p1661_p6 = pneg %p2046_p5  ;;  %s306_s23 = sshll.u32 %s1938_s22, 4  ;;  %s2060_s23 = int_to_ptr.vmem [resolvable:$true] %s306_s23 }
  0x13   : > { %s1939_s24 = smov [#allocation8]   ;;  %s1763_s28 = scalar_lea.hbm %s2364_s2, 256 }
  0x14   : > { %p2056_p7 = pnand %p1661_p6, %p2034_p1  ;;  %s2062_s25 = sshll.u32 %s1939_s24, 4  ;;  %s326_s25 = int_to_ptr.vmem [resolvable:$true] %s2062_s25 }
  0x15   : > { %p1764_p8 = scmp.ne.s32.totalorder %s2364_s2, %s1763_s28  ;;  %p1770_p12 = scmp.lt.u32.totalorder %s1763_s28, %s2364_s2 }
  0x16   : > { %p2072_p9 = pneg %p2056_p7 }
  0x18   : > { %p1766_p10 = pnand %p2072_p9, %p1764_p8 }
  0x1a   : > { %p1767_p11 = pneg %p1766_p10 }
  0x1c   : > { %p1772_p13 = pnand %p1770_p12, %p1767_p11 }
  0x1e   : > { %1775 = shalt.err (!%p1772_p13)
}
  0x1f   : > { %s1776_s24 = scalar_lea.vmem %s2050_s20, 256  ;;  %p1784_p6 = scmp.lt.s32.totalorder %s2050_s20, %s2050_s20 }
  0x20   : > { %p1777_p0 = scmp.ne.s32.totalorder %s2050_s20, %s1776_s24  ;;  %p1785_p1 = scmp.lt.s32.totalorder %s1776_s24, %s1776_s24 }
  0x22   : > { %p1779_p2 = pnand %p1777_p0, %p2072_p9  ;;  %p1786_p8 = por %p1785_p1, %p1784_p6 }
  0x24   : > { %p1780_p3 = pneg %p1779_p2 }
  0x26   : > { %p1787_p10 = pnand %p1786_p8, %p1780_p3 }
  0x28   : > { %1790 = shalt.err (!%p1787_p10)
}
  0x29   : > { %s1940_s26 = smov 64   ;;  %s1941_s27 = smov 4  }
  0x2a   : > { %1664 = dma.hbm_to_vmem [thread:$0]  (!%p2056_p7), %s2364_s2, 256, %s2050_s20, [#allocation6], %s1940_s26, %s1940_s26, %s1941_s27  }
  0x2b   : > { %s1791_s22 = scalar_lea.hbm %s2365_s3, 256 }
  0x2c   : > { %p1792_p1 = scmp.ne.s32.totalorder %s2365_s3, %s1791_s22  ;;  %p1798_p13 = scmp.lt.u32.totalorder %s1791_s22, %s2365_s3 }
  0x2e   : > { %p1794_p11 = pnand %p1792_p1, %p2072_p9 }
  0x30   : > { %p1795_p12 = pneg %p1794_p11 }
  0x32   : > { %p1800_p0 = pnand %p1798_p13, %p1795_p12 }
  0x34   : > { %1803 = shalt.err (!%p1800_p0)
}
  0x35   : > { %s1804_s20 = scalar_lea.vmem %s2060_s23, 256  ;;  %p1812_p8 = scmp.lt.s32.totalorder %s2060_s23, %s2060_s23 }
  0x36   : > { %p1805_p2 = scmp.ne.s32.totalorder %s2060_s23, %s1804_s20  ;;  %p1813_p10 = scmp.lt.s32.totalorder %s1804_s20, %s1804_s20 }
  0x38   : > { %p1807_p3 = pnand %p1805_p2, %p2072_p9  ;;  %p1814_p1 = por %p1813_p10, %p1812_p8 }
  0x3a   : > { %p1808_p6 = pneg %p1807_p3 }
  0x3c   : > { %p1815_p11 = pnand %p1814_p1, %p1808_p6 }
  0x3e   : > { %1818 = shalt.err (!%p1815_p11)
}
  0x3f   : > { %1667 = dma.hbm_to_vmem [thread:$0]  (!%p2056_p7), %s2365_s3, 256, %s2060_s23, [#allocation6], %s1940_s26, %s1940_s26, %s1941_s27  }
  0x40   : > { %s1819_s29 = scalar_lea.hbm %s2368_s6, 256 }
  0x41   : > { %p1820_p12 = scmp.ne.s32.totalorder %s2368_s6, %s1819_s29  ;;  %p1826_p2 = scmp.lt.u32.totalorder %s1819_s29, %s2368_s6 }
  0x43   : > { %p1822_p13 = pnand %p1820_p12, %p2072_p9 }
  0x45   : > { %p1823_p0 = pneg %p1822_p13 }
  0x47   : > { %p1828_p3 = pnand %p1826_p2, %p1823_p0 }
  0x49   : > { %1831 = shalt.err (!%p1828_p3)
}
  0x4a   : > { %s1832_s20 = scalar_lea.vmem %s326_s25, 256  ;;  %p1840_p1 = scmp.lt.s32.totalorder %s326_s25, %s326_s25 }
  0x4b   : > { %p1833_p6 = scmp.ne.s32.totalorder %s326_s25, %s1832_s20  ;;  %p1841_p11 = scmp.lt.s32.totalorder %s1832_s20, %s1832_s20 }
  0x4d   : > { %p1835_p8 = pnand %p1833_p6, %p2072_p9  ;;  %p1842_p4 = por %p1841_p11, %p1840_p1 }
  0x4f   : > { %p1836_p10 = pneg %p1835_p8 }
  0x51   : > { %p1843_p5 = pnand %p1842_p4, %p1836_p10 }
  0x53   : > { %1846 = shalt.err (!%p1843_p5)
}
  0x54   : > { %1670 = dma.hbm_to_vmem [thread:$0]  (!%p2056_p7), %s2368_s6, 256, %s326_s25, [#allocation9], %s1940_s26, %s1940_s26, %s1941_s27  }
  0x55   : > { %s74_s15 = sadd.s32 1, %s1923_s11  ;;  %s37_s5 = sadd.s32 1, %s1931_s13 }
  0x56   : > { %p81_p4 = scmp.ne.s32.totalorder %s1923_s11, %s1919_s10  ;;  %p39_p5 = scmp.ge.s32.totalorder %s37_s5, 2 }
  0x57   : > { %p82_p9 = scmp.eq.s32.totalorder %s1935_s14, 0  ;;  %p1678_p12 = scmp.lt.s32.totalorder %s1935_s14, 2 }
  0x58   : > { %s352_s21 = sand.u32 1, %s1923_s11   ;;  %s2397_s5 = smov (%p39_p5, %s37_s5), 0 }
  0x59   : > { %p83_p13 = por %p82_p9, %p81_p4  ;;  %s69_s8 = ssub.s32 %s1931_s13, %s2397_s5 }
  0x5a   : > { %s1502_s28 = sshll.u32 %s352_s21, 5  ;;  %p72_p0 = scmp.eq.s32.totalorder %s69_s8, 0 }
  0x5b   : > { %s1540_s29 = sshll.u32 %s1931_s13, 9  ;;  %s356_s30 = scalar_lea.vmem [#allocation3], %s1502_s28 }
  0x5c   : > { %s365_s19 = sshll.u32 %s356_s30, 4  ;;  %s2162_s22 = scalar_lea.hbm %s2363_s1, %s1540_s29  ;;  %s2164_s19 = int_to_ptr.vmem [resolvable:$true] %s365_s19 }
  0x5d   : > { %s2157_s25 = scalar_select %p72_p0, %s1923_s11, %s74_s15  }
  0x5e   : > { %p2168_p7 = pnand %p1678_p12, %p83_p13  ;;  %s2172_s20 = scalar_lea.sflag [#allocation4], %s352_s21 }
  0x5f   : > { %s1847_s23 = scalar_lea.hbm %s2162_s22, 512  ;;  %s1852_s8 = scalar_lea.hbm %s2363_s1, 1024 }
  0x60   : > { %p1848_p2 = scmp.ne.s32.totalorder %s2162_s22, %s1847_s23  ;;  %p1849_p3 = pneg %p2168_p7 }
  0x61   : > { %p1853_p10 = scmp.lt.u32.totalorder %s2162_s22, %s2363_s1  ;;  %p1854_p1 = scmp.lt.u32.totalorder %s1852_s8, %s1847_s23 }
  0x62   : > { %p1850_p6 = pnand %p1849_p3, %p1848_p2  ;;  %p1856_p4 = scmp.lt.u32.totalorder %s1847_s23, %s2162_s22 }
  0x63   : > { %p1855_p11 = por %p1854_p1, %p1853_p10 }
  0x64   : > { %p1851_p8 = pneg %p1850_p6 }
  0x65   : > { %p1857_p5 = por %p1856_p4, %p1855_p11 }
  0x67   : > { %p1858_p9 = pnand %p1857_p5, %p1851_p8 }
  0x69   : > { %1861 = shalt.err (!%p1858_p9)
}
  0x6a   : > { %s1862_s21 = scalar_lea.vmem %s2164_s19, 512  ;;  %s1942_s30 = smov [#allocation3]  }
  0x6b   : > { %p1863_p12 = scmp.ne.s32.totalorder %s2164_s19, %s1862_s21  ;;  %s1867_s26 = sshll.u32 %s1942_s30, 4  ;;  %s1868_s26 = int_to_ptr.vmem [resolvable:$false] %s1867_s26 }
  0x6c   : > { %s1869_s27 = scalar_lea.vmem %s1868_s26, 1024  ;;  %p1870_p2 = scmp.lt.s32.totalorder %s2164_s19, %s1868_s26 }
  0x6d   : > { %p1865_p13 = pnand %p1863_p12, %p1849_p3  ;;  %p1871_p6 = scmp.lt.s32.totalorder %s1869_s27, %s1862_s21 }
  0x6f   : > { %p1866_p0 = pneg %p1865_p13  ;;  %p1872_p10 = por %p1871_p6, %p1870_p2 }
  0x71   : > { %p1873_p1 = pnand %p1872_p10, %p1866_p0 }
  0x73   : > { %1876 = shalt.err (!%p1873_p1)
}
  0x74   : > { %s1943_s23 = smov 128   ;;  %s1944_s4 = smov 8  }
  0x75   : > { %1674 = dma.hbm_to_vmem [thread:$0]  (!%p2168_p7), %s2162_s22, 512, %s2164_s19, %s2172_s20, %s1943_s23, %s1943_s23, %s1944_s4  }
  0x76   : > { %p2385_p3 = scmp.ne.s32.totalorder %s2381_s18, 0 }
  0x77   : > { %s379_s15 = sand.u32 (!%p2385_p3), 1, %s1919_s10   ;;  %p2386_p8 = scmp.ne.s32.totalorder (!%p2385_p3), %s2380_s17, 0 }
  0x78   : > { %377 = sbr.rel (%p2385_p3) target bundleno = 1375 (0x55f), region = 48  ;;  %s1506_s8 = sshll.u32 (!%p2385_p3), %s379_s15, 5 }
  0x79   : > { %s380_s28 = scalar_lea.sflag (!%p2385_p3), [#allocation4], %s379_s15  ;;  %s383_s29 = scalar_lea.vmem (!%p2385_p3), [#allocation3], %s1506_s8 }
  0x7f   : > { %1902 = dma.done.wait (%p2386_p8), %s380_s28, 512  }
  0x80   : > { %1904 = vsyncadd (%p2386_p8), %s380_s28, 4294966784  ;;  %p2387_p11 = scmp.ne.s32.totalorder %s2379_s16, 0 }
  0x82   : > { %1906 = dma.done.wait (%p2387_p11), [#allocation6], 512  }
  0x83   : > { %1908 = vsyncadd (%p2387_p11), [#allocation6], 4294966784 }
  0x84   : > { %1910 = dma.done.wait (%p2387_p11), [#allocation9], 256  }
  0x85   : > { %1912 = vsyncadd (%p2387_p11), [#allocation9], 4294967040  ;;  %p447_p7 = scmp.lt.s32.totalorder %s1927_s12, 1  ;;  %vm474_vm0 = vcmask 253952   ;;  %v1945_v0 = vmov 0.0   ;;  %v1747_v1 = vld [vmem:[#allocation7] sm:$0xff]   ;;  %v673_v51 = vlaneseq }
  0x86   : > { %v1748_v2 = vld [vmem:[#allocation7 + $0x8] sm:$0xff]   ;;  %1583 = vmatprep.subr.bf16.mxu1 %v1747_v1  ;;  %v1749_v3 = vld [vmem:[#allocation5] sm:$0xff]   ;;  %vm477_vm1 = vcmask 261120   ;;  %v565_v5 = vld [vmem:[%s383_s29 + $0x8] sm:$0xff]  ;;  %v1946_v17 = vmov -inf   ;;  %s2388_s15 = sld [smem:[#allocation14_spill]] }
  0x87   : > { %s2399_s12 = smov (!%p447_p7, %s1927_s12), 1  ;;  %1584 = vmatpush3.bf16.msra.mxu1 %v1747_v1  ;;  %v564_v4 = vld [vmem:[%s383_s29] sm:$0xff]  ;;  %v566_v6 = vld [vmem:[%s383_s29 + $0x10] sm:$0xff]  ;;  %1575 = vmatprep.subr.bf16.mxu0 %v1749_v3  ;;  %v567_v8 = vld [vmem:[%s383_s29 + $0x18] sm:$0xff]  ;;  %475 = vst.msk [vmem:[#allocation2] sm:$0x1] %vm474_vm0, %v1946_v17 }
  0x88   : > { %s2223_s19 = scalar_lea.vmem %s2371_s9, %s2399_s12  ;;  %s1541_s16 = sshll.u32 %s2399_s12, 5  ;;  %1585 = vmatprep.subr.bf16.mxu1 %v1748_v2  ;;  %v568_v7 = vpack.c.bf16 %v565_v5, %v564_v4  ;;  %1576 = vmatpush3.bf16.msra.mxu0 %v1749_v3  ;;  %v1750_v9 = vld [vmem:[#allocation5 + $0x8] sm:$0xff]   ;;  %v569_v12 = vpack.c.bf16 %v567_v8, %v566_v6  ;;  %v674_v54 = vshrl.u32 %v673_v51, 7  ;;  %vm1950_vm2 = vmmov 0  }
  0x89   : > { %476 = vst.msk [vmem:[%s2223_s19] sm:$0x1] %vm474_vm0, %v1945_v0  ;;  %s454_s20 = scalar_lea.vmem %s2362_s0, %s1541_s16  ;;  %1577 = vmatprep.subr.bf16.mxu0 %v1750_v9  ;;  %s1512_s21 = sshll.u32 %s2399_s12, 3  ;;  %vm1007_vm3 = vcmask 64512   ;;  %vm1009_vm4 = vcmask 130048   ;;  %vm1011_vm5 = vcmask 195584  }
  0x8a   : > { %v479_v10 = vld [vmem:[%s454_s20] sm:$0xff]  ;;  %v480_v11 = vld [vmem:[%s454_s20 + $0x8] sm:$0xff]  ;;  %1587 = vmatprep.mubr.msk.bf16.mxu1 %vm477_vm1, %v568_v7  ;;  %v481_v14 = vld [vmem:[%s454_s20 + $0x10] sm:$0xff]  ;;  %s2243_s27 = scalar_lea.vmem %s2369_s7, %s1512_s21  ;;  %s2389_s29 = sld [smem:[#allocation13_spill]]  ;;  %v675_v58 = vsub.s32 0, %v674_v54  ;;  %vm1043_vm6 = vcmask 1043456  }
  0x8b   : > { %v483_v13 = vpack.c.bf16 %v480_v11, %v479_v10  ;;  %v482_v15 = vld [vmem:[%s454_s20 + $0x18] sm:$0xff]  ;;  %1586 = vmatpush3.bf16.msra.mxu1 %v1748_v2  ;;  %478 = vst.msk [vmem:[%s2243_s27] sm:$0xff] %vm477_vm1, %v1945_v0  ;;  %s1947_s17 = smov 120   ;;  %s1948_s18 = smov 112   ;;  %vm1299_vm7 = vcmask 257024  }
  0x8c   : > { %v484_v16 = vpack.c.bf16 %v482_v15, %v481_v14  ;;  %1599 = vmatprep.subr.bf16.mxu1 %v1945_v0  ;;  %1578 = vmatpush3.bf16.msra.mxu0 %v1750_v9  ;;  %v1520_v19 = vld [vmem:[%s2388_s15] ss:$0 sm:$0xff]  ;;  %s1949_s16 = smov 104   ;;  %s1951_s22 = smov 16  }
  0x8d   : > { %1579 = vmatprep.mubr.msk.bf16.mxu0 %vm477_vm1, %v483_v13  ;;  %1591 = vmatprep.subr.bf16.mxu0 %v1945_v0  ;;  %s1952_s24 = smov 8   ;;  %s1953_s20 = smov 24  }
  0x8e   : > { %1588 = vmatmul.mubr.msk.bf16.vlgmr.msra.gmra.mrb[0].mxu1 %vm477_vm1, %v569_v12  ;;  %v667_v56 = vld [vmem:[#allocation2] sm:$0x1]  ;;  %s2390_s26 = sld [smem:[#allocation15_spill]] }
  0x8f   : > { %1580 = vmatmul.mubr.msk.bf16.vlgmr.msra.gmra.mrb[0].mxu0 %vm477_vm1, %v484_v16  ;;  %1603 = vmatprep.mubr.msk.bf16.mxu1 %vm1950_vm2, %v1945_v0 }
  0x90   : > { %v1515_v20 = vld [vmem:[%s2389_s29] ss:$0 sm:$0xff]  ;;  %1595 = vmatprep.mubr.msk.bf16.mxu0 %vm1950_vm2, %v1945_v0 }
 0x161   : > { %v1589_v18 = vpop.f32.mrb[0].mxu1 }
 0x162   : > { %v633_v21 = vpop.f32.mrb[1].mxu1  ;;  %v1581_v23 = vpop.f32.mrb[0].mxu0  ;;  %v642_v24 = vadd.f32 %v1589_v18, %v1520_v19 }
 0x163   : > { %v1590_v22 = vpop.f32.mrb[2].mxu1  ;;  %v558_v27 = vadd.f32 %v1581_v23, %v1515_v20  ;;  %v549_v28 = vpop.f32.mrb[1].mxu0  ;;  %v634_v29 = vadd.f32 %v1520_v19, %v633_v21 }
 0x164   : > { %v645_v25 = vadd.f32 %v1590_v22, %v1520_v19  ;;  %v636_v26 = vpop.f32.mrb[3].mxu1  ;;  %v550_v31 = vadd.f32 %v1515_v20, %v549_v28  ;;  %v1582_v32 = vpop.f32.mrb[2].mxu0 }
 0x165   : > { %v637_v30 = vadd.f32 %v1520_v19, %v636_v26  ;;  %v652_v34 = vmul.f32 0.59460354, %v558_v27  ;;  %v561_v35 = vadd.f32 %v1582_v32, %v1515_v20  ;;  %v552_v36 = vpop.f32.mrb[3].mxu0  ;;  %v690_v26 = vld [vmem:[%s2223_s19] sm:$0x1] }
 0x166   : > { %v2254_v33 = vpack.c.bf16 %v645_v25, %v642_v24  ;;  %v650_v38 = vmul.f32 0.59460354, %v550_v31  ;;  %v553_v39 = vadd.f32 %v1515_v20, %v552_v36 }
 0x167   : > { %v648_v37 = vpack.c.bf16 %v637_v30, %v634_v29  ;;  %v656_v40 = vsel %vm477_vm1, %v652_v34, -inf  ;;  %v653_v41 = vmul.f32 0.59460354, %v561_v35 }
 0x168   : > { %774 = vrot.lane.b32.xlu0 %v2254_v33, %s1947_s17  ;;  %v654_v42 = vsel %vm477_vm1, %v650_v38, -inf  ;;  %v651_v43 = vmul.f32 0.59460354, %v553_v39 }
 0x169   : > { %845 = vrot.lane.b32.xlu1 %v648_v37, %s1948_s18  ;;  %v657_v44 = vsel %vm477_vm1, %v653_v41, -inf }
 0x16a   : > { %v659_v45 = vmax.f32 %v656_v40, %v657_v44  ;;  %v655_v46 = vsel %vm477_vm1, %v651_v43, -inf }
 0x16b   : > { %v658_v47 = vmax.f32 %v654_v42, %v655_v46 }
 0x16c   : > { %847 = vrot.lane.b32.xlu0 %v2254_v33, %s1948_s18 }
 0x16d   : > { %916 = vrot.lane.b32.xlu1 %v648_v37, %s1949_s16  ;;  %v660_v48 = vmax.f32 %v658_v47, %v659_v45 }
 0x16f   : > { %v661_v49 = vrot.slane %v660_v48, 4 }
 0x170   : > { %772 = vrot.lane.b32.xlu0 %v648_v37, %s1947_s17 }
 0x171   : > { %918 = vrot.lane.b32.xlu1 %v2254_v33, %s1949_s16  ;;  %v662_v50 = vmax.f32 %v660_v48, %v661_v49 }
 0x173   : > { %v663_v52 = vrot.slane %v662_v50, 2 }
 0x175   : > { %v664_v53 = vmax.f32 %v662_v50, %v663_v52 }
 0x177   : > { %v665_v55 = vrot.slane %v664_v53, 1 }
 0x179   : > { %v666_v57 = vmax.f32 %v664_v53, %v665_v55 }
 0x17b   : > { %v668_v59 = vmax.f32 %v667_v56, %v666_v57 }
 0x17d   : > { %v669_v60 = vsub.f32 %v667_v56, %v668_v59  ;;  %v676_v61 = vrot.slane %v668_v59, %v675_v58  ;;  %708 = vst.msk [vmem:[#allocation2] sm:$0x1] %vm474_vm0, %v668_v59 }
 0x17f   : > { %v678_v62 = vsub.f32 %v650_v38, %v676_v61  ;;  %v679_v63 = vsub.f32 %v651_v43, %v676_v61  ;;  %v680_v1 = vsub.f32 %v652_v34, %v676_v61  ;;  %v681_v2 = vsub.f32 %v653_v41, %v676_v61 }
 0x180   : > { %v670_v3 = vmul.f32 1.442695, %v669_v60 }
 0x181   : > { %v682_v4 = vmul.f32 1.442695, %v678_v62  ;;  %v684_v5 = vmul.f32 1.442695, %v679_v63  ;;  %v686_v6 = vmul.f32 1.442695, %v680_v1 }
 0x182   : > { %v688_v7 = vmul.f32 1.442695, %v681_v2  ;;  %1751 = vpow2.f32 %v670_v3 }
 0x183   : > { %1753 = vpow2.f32 %v682_v4  ;;  %v987_v4 = vld [vmem:[%s2243_s27] sm:$0xff] }
 0x184   : > { %1755 = vpow2.f32 %v684_v5 }
 0x185   : > { %1757 = vpow2.f32 %v686_v6 }
 0x186   : > { %1759 = vpow2.f32 %v688_v7 }
 0x18c   : > { %v1752_v8 = vpop.eup %1751 }
 0x18d   : > { %v1754_v9 = vpop.eup %1753  ;;  %v2270_v10 = vrot.slane %v1752_v8, %v675_v58  ;;  %v691_v29 = vmul.f32 %v1752_v8, %v690_v26 }
 0x18e   : > { %711 = vxpose.xlu0.c.b16.start [1/2] (short) (narrow) %v648_v37, 16  ;;  %v1756_v11 = vpop.eup %1755  ;;  %v692_v12 = vsel %vm477_vm1, %v1754_v9, 0.0 }
 0x18f   : > { %v1758_v13 = vpop.eup %1757  ;;  %v693_v14 = vsel %vm477_vm1, %v1756_v11, 0.0  ;;  %v709_v15 = vpack.c.bf16 %v1756_v11, %v1754_v9  ;;  %v994_v8 = vmul.f32 %v2270_v10, %v987_v4 }
 0x190   : > { %v1760_v16 = vpop.eup %1759  ;;  %v694_v17 = vadd.f32 %v693_v14, %v692_v12  ;;  %v695_v18 = vsel %vm477_vm1, %v1758_v13, 0.0  ;;  %v1019_v12 = vld [vmem:[#allocation8] sm:$0xf] }
 0x191   : > { %v697_v19 = vsel %vm477_vm1, %v1760_v16, 0.0  ;;  %v710_v20 = vpack.c.bf16 %v1760_v16, %v1758_v13  ;;  %1592 = vmatpush3.bf16.msra.mxu0 %v709_v15  ;;  %v1020_v13 = vld [vmem:[#allocation8 + $0x4] sm:$0xf]  ;;  %v1045_v14 = vsel %vm1043_vm6, %v1019_v12, 0 }
 0x192   : > { %712 = vxpose.xlu0.c.b16.end [2/2] (short) (narrow) %v2254_v33, 16  ;;  %v696_v21 = vadd.f32 %v695_v18, %v694_v17  ;;  %1593 = vmatprep.subr.bf16.mxu0 %v1945_v0 }
 0x193   : > { %798 = vrot.lane.b32.xlu1 %v710_v20, %s1947_s17 }
 0x194   : > { %v698_v22 = vadd.f32 %v697_v19, %v696_v21 }
 0x195   : > { %1594 = vmatpush3.bf16.msra.mxu0 %v710_v20 }
 0x196   : > { %v699_v23 = vrot.slane %v698_v22, 4  ;;  %1607 = vmatprep.subr.bf16.mxu0 %v1945_v0 }
 0x197   : > { %938 = vrot.lane.b32.xlu1 %v709_v15, %s1949_s16 }
 0x198   : > { %v700_v24 = vadd.f32 %v699_v23, %v698_v22  ;;  %v1021_v22 = vld [vmem:[#allocation8 + $0x8] sm:$0xf] }
 0x199   : > { %v1176_v23 = vsel %vm1043_vm6, %v1021_v22, 0 }
 0x19a   : > { %v701_v25 = vrot.slane %v700_v24, 2 }
 0x19b   : > { %796 = vrot.lane.b32.xlu0 %v709_v15, %s1947_s17  ;;  %940 = vrot.lane.b32.xlu1 %v710_v20, %s1949_s16 }
 0x19c   : > { %v702_v27 = vadd.f32 %v701_v25, %v700_v24  ;;  %v1022_v25 = vld [vmem:[#allocation8 + $0xc] sm:$0xf] }
 0x19d   : > { %v1241_v26 = vsel %vm1043_vm6, %v1022_v25, 0 }
 0x19e   : > { %v703_v28 = vrot.slane %v702_v27, 1 }
 0x19f   : > { %867 = vrot.lane.b32.xlu0 %v709_v15, %s1948_s18  ;;  %v1111_v15 = vsel %vm1043_vm6, %v1020_v13, 0 }
 0x1a0   : > { %v704_v30 = vadd.f32 %v703_v28, %v702_v27 }
 0x1a2   : > { %v705_v31 = vadd.f32 %v704_v30, %v691_v29 }
 0x1a3   : > { %869 = vrot.lane.b32.xlu0 %v710_v20, %s1948_s18 }
 0x1a4   : > { %707 = vst.msk [vmem:[%s2223_s19] sm:$0x1] %vm474_vm0, %v705_v31 }
 0x1ab   : > { %v1537_v5 = vld [vmem:[%s2223_s19] ss:$0 sm:$0xff]  ;;  %s1542_s19 = sshll.u32 %s2399_s12, 4 }
 0x1ac   : > { %1761 = vrcp.f32 %v1537_v5 }
 0x1b6   : > { %v1762_v10 = vpop.eup %1761 }
 0x1da   : > { %v775_v32 = vpop.permute.xlu0 %774 }
 0x1db   : > { %v846_v33 = vpop.permute.xlu1 %845 }
 0x1dc   : > { %851 = vxpose.xlu0.c.b16.start [1/2] (short) (narrow) %v846_v33, 16 }
 0x1de   : > { %v848_v34 = vpop.permute.xlu0 %847 }
 0x1df   : > { %v917_v36 = vpop.permute.xlu1 %916 }
 0x1e0   : > { %852 = vxpose.xlu0.c.b16.end [2/2] (short) (narrow) %v848_v34, 16 }
 0x1e2   : > { %v773_v35 = vpop.permute.xlu0 %772 }
 0x1e3   : > { %778 = vxpose.xlu1.c.b16.start [1/2] (short) (narrow) %v773_v35, 16  ;;  %v919_v37 = vpop.permute.xlu1 %918 }
 0x1e7   : > { %779 = vxpose.xlu1.c.b16.end [2/2] (short) (narrow) %v775_v32, 16 }
 0x1eb   : > { %922 = vxpose.xlu1.c.b16.start [1/2] (short) (narrow) %v917_v36, 16 }
 0x1ef   : > { %923 = vxpose.xlu1.c.b16.end [2/2] (short) (narrow) %v919_v37, 16 }
 0x1f4   : > { %v719_v38 = vpop.trf.xlu0 }
 0x1f5   : > { %1596 = vmatmul.mubr.msk.bf16.vlgmr.msra.gmra.mrb[4].mxu0 %vm477_vm1, %v719_v38 }
 0x1f6   : > { %1611 = vmatprep.mubr.msk.bf16.mxu0 %vm1950_vm2, %v1945_v0 }
 0x205   : > { %v799_v40 = vpop.permute.xlu1 %798 }
 0x209   : > { %v939_v43 = vpop.permute.xlu1 %938 }
 0x20d   : > { %v797_v39 = vpop.permute.xlu0 %796  ;;  %v941_v45 = vpop.permute.xlu1 %940 }
 0x20e   : > { %1600 = vmatpush3.bf16.msra.mxu1 %v797_v39 }
 0x20f   : > { %1601 = vmatprep.subr.bf16.mxu1 %v1945_v0 }
 0x211   : > { %v868_v41 = vpop.permute.xlu0 %867 }
 0x212   : > { %1608 = vmatpush3.bf16.msra.mxu0 %v868_v41  ;;  %1602 = vmatpush3.bf16.msra.mxu1 %v799_v40 }
 0x213   : > { %1609 = vmatprep.subr.bf16.mxu0 %v1945_v0  ;;  %1615 = vmatprep.subr.bf16.mxu1 %v1945_v0 }
 0x215   : > { %v870_v42 = vpop.permute.xlu0 %869 }
 0x216   : > { %1610 = vmatpush3.bf16.msra.mxu0 %v870_v42 }
 0x217   : > { %1623 = vmatprep.subr.bf16.mxu0 %v1945_v0 }
 0x242   : > { %v859_v44 = vpop.trf.xlu0 }
 0x243   : > { %1612 = vmatmul.mubr.msk.bf16.vlgmr.msra.gmra.mrb[8].mxu0 %vm477_vm1, %v859_v44 }
 0x244   : > { %1625 = vmatprep.mubr.msk.bf16.mxu0 %vm1950_vm2, %v1945_v0  ;;  %1624 = vmatpush3.bf16.msra.mxu0 %v1045_v14 }
 0x245   : > { %1635 = vmatprep.subr.bf16.mxu0 %v1945_v0 }
 0x249   : > { %v786_v46 = vpop.trf.xlu1 }
 0x24a   : > { %1604 = vmatmul.mubr.msk.bf16.vlgmr.msra.gmra.mrb[4].mxu1 %vm477_vm1, %v786_v46 }
 0x24b   : > { %1616 = vmatpush3.bf16.msra.mxu1 %v939_v43  ;;  %1619 = vmatprep.mubr.msk.bf16.mxu1 %vm1950_vm2, %v1945_v0 }
 0x24c   : > { %1617 = vmatprep.subr.bf16.mxu1 %v1945_v0 }
 0x24f   : > { %1618 = vmatpush3.bf16.msra.mxu1 %v941_v45 }
 0x250   : > { %1629 = vmatprep.subr.bf16.mxu1 %v1945_v0 }
 0x251   : > { %v930_v47 = vpop.trf.xlu1 }
 0x252   : > { %1620 = vmatmul.mubr.msk.bf16.vlgmr.msra.gmra.mrb[8].mxu1 %vm477_vm1, %v930_v47 }
 0x253   : > { %1631 = vmatprep.mubr.msk.bf16.mxu1 %vm1950_vm2, %v1945_v0  ;;  %1630 = vmatpush3.bf16.msra.mxu1 %v1111_v15 }
 0x254   : > { %1641 = vmatprep.subr.bf16.mxu1 %v1945_v0 }
 0x2c8   : > { %v764_v48 = vpop.f32.mrb[4].mxu0 }
 0x2c9   : > { %v1597_v49 = vpop.f32.mrb[5].mxu0 }
 0x2ca   : > { %v767_v50 = vpop.f32.mrb[6].mxu0 }
 0x2cb   : > { %v1598_v51 = vpop.f32.mrb[7].mxu0 }
 0x316   : > { %v910_v52 = vpop.f32.mrb[8].mxu0 }
 0x317   : > { %1000 = vrot.lane.b32.xlu1 %v910_v52, %s1951_s22  ;;  %v1613_v53 = vpop.f32.mrb[9].mxu0 }
 0x318   : > { %v913_v54 = vpop.f32.mrb[10].mxu0 }
 0x319   : > { %v1614_v55 = vpop.f32.mrb[11].mxu0 }
 0x31d   : > { %v839_v56 = vpop.f32.mrb[4].mxu1 }
 0x31e   : > { %996 = vrot.lane.b32.xlu0 %v839_v56, %s1952_s24  ;;  %v1605_v57 = vpop.f32.mrb[5].mxu1 }
 0x31f   : > { %v842_v58 = vpop.f32.mrb[6].mxu1 }
 0x320   : > { %v1606_v59 = vpop.f32.mrb[7].mxu1 }
 0x325   : > { %v981_v60 = vpop.f32.mrb[8].mxu1 }
 0x326   : > { %1004 = vrot.lane.b32.xlu0 %v981_v60, %s1953_s20  ;;  %v1621_v61 = vpop.f32.mrb[9].mxu1 }
 0x327   : > { %v984_v62 = vpop.f32.mrb[10].mxu1 }
 0x328   : > { %v1622_v63 = vpop.f32.mrb[11].mxu1 }
 0x389   : > { %v1001_v3 = vpop.permute.xlu1 %1000 }
 0x390   : > { %v997_v1 = vpop.permute.xlu0 %996 }
 0x391   : > { %v1008_v2 = vsel %vm1007_vm3, %v764_v48, %v997_v1 }
 0x392   : > { %v1010_v6 = vsel %vm1009_vm4, %v1008_v2, %v1001_v3 }
 0x398   : > { %v1005_v7 = vpop.permute.xlu0 %1004 }
 0x399   : > { %v1012_v9 = vsel %vm1011_vm5, %v1010_v6, %v1005_v7 }
 0x39a   : > { %v1013_v11 = vadd.f32 %v1012_v9, %v994_v8 }
 0x39c   : > { %1014 = vst.msk [vmem:[%s2243_s27] sm:$0xff] %vm477_vm1, %v1013_v11 }
 0x3a3   : > { %v1018_v16 = vld [vmem:[%s2243_s27] sm:$0xff] }
 0x3a4   : > { %v1023_v17 = vpack.c.bf16 %v1018_v16, %v1018_v16  ;;  %v1312_v18 = vmul.f32 %v1762_v10, %v1018_v16 }
 0x3a6   : > { %1153 = vrot.lane.b32.xlu0 %v1023_v17, %s1948_s18  ;;  %1313 = vst.msk [vmem:[%s2243_s27] sm:$0xff] %vm477_vm1, %v1312_v18  ;;  %1088 = vrot.lane.b32.xlu1 %v1023_v17, %s1947_s17  ;;  %s465_s27 = scalar_lea.vmem %s2390_s26, %s1542_s19 }
 0x3aa   : > { %1218 = vrot.lane.b32.xlu1 %v1023_v17, %s1949_s16 }
 0x3c4   : > { %1024 = vxpose.xlu0.c.b16.start.end [1/1] (short) (narrow) %v1023_v17, 16 }
 0x418   : > { %v1154_v19 = vpop.permute.xlu0 %1153  ;;  %v1089_v20 = vpop.permute.xlu1 %1088 }
 0x419   : > { %1156 = vxpose.xlu0.c.b16.start.end [1/1] (short) (narrow) %v1154_v19, 16  ;;  %1091 = vxpose.xlu1.c.b16.start.end [1/1] (short) (narrow) %v1089_v20, 16 }
 0x41c   : > { %v1219_v21 = vpop.permute.xlu1 %1218 }
 0x41d   : > { %1221 = vxpose.xlu0.c.b16.start.end [1/1] (short) (narrow) %v1219_v21, 16 }
 0x42a   : > { %v1032_v24 = vpop.trf.xlu0 }
 0x42b   : > { %1626 = vmatmul.mubr.msk.bf16.vlgmr.msra.gmra.mrb[12].mxu0 %vm1007_vm3, %v1032_v24 }
 0x42c   : > { %1636 = vmatpush3.bf16.msra.mxu0 %v1176_v23  ;;  %1637 = vmatprep.mubr.msk.bf16.mxu0 %vm1950_vm2, %v1945_v0 }
 0x47f   : > { %v1099_v27 = vpop.trf.xlu1  ;;  %v1164_v28 = vpop.trf.xlu0 }
 0x480   : > { %1632 = vmatmul.mubr.msk.bf16.vlgmr.msra.gmra.mrb[12].mxu1 %vm1007_vm3, %v1099_v27  ;;  %1638 = vmatmul.mubr.msk.bf16.vlgmr.msra.gmra.mrb[16].mxu0 %vm1007_vm3, %v1164_v28 }
 0x481   : > { %1642 = vmatpush3.bf16.msra.mxu1 %v1241_v26  ;;  %1643 = vmatprep.mubr.msk.bf16.mxu1 %vm1950_vm2, %v1945_v0 }
 0x483   : > { %v1229_v29 = vpop.trf.xlu0 }
 0x488   : > { %1644 = vmatmul.mubr.msk.bf16.vlgmr.msra.gmra.mrb[16].mxu1 %vm1007_vm3, %v1229_v29 }
 0x4fe   : > { %v1081_v30 = vpop.f32.mrb[12].mxu0 }
 0x4ff   : > { %v1543_v31 = vpack.c.bf16 %v1081_v30, %v1081_v30  ;;  %v1627_v32 = vpop.f32.mrb[13].mxu0 }
 0x500   : > { %v1084_v33 = vpop.f32.mrb[14].mxu0 }
 0x501   : > { %1300 = vst.msk [vmem:[%s465_s27] sm:$0xf] %vm1299_vm7, %v1543_v31  ;;  %v1628_v34 = vpop.f32.mrb[15].mxu0 }
 0x553   : > { %v1147_v35 = vpop.f32.mrb[12].mxu1  ;;  %v1212_v36 = vpop.f32.mrb[16].mxu0 }
 0x554   : > { %v1544_v37 = vpack.c.bf16 %v1147_v35, %v1147_v35  ;;  %v1633_v0 = vpop.f32.mrb[13].mxu1  ;;  %v1545_v38 = vpack.c.bf16 %v1212_v36, %v1212_v36  ;;  %v1639_v39 = vpop.f32.mrb[17].mxu0 }
 0x555   : > { %v1150_v40 = vpop.f32.mrb[14].mxu1  ;;  %v1215_v41 = vpop.f32.mrb[18].mxu0 }
 0x556   : > { %1301 = vst.msk [vmem:[%s465_s27 + $0x4] sm:$0xf] %vm1299_vm7, %v1544_v37  ;;  %1302 = vst.msk [vmem:[%s465_s27 + $0x8] sm:$0xf] %vm1299_vm7, %v1545_v38  ;;  %v1634_v42 = vpop.f32.mrb[15].mxu1  ;;  %v1640_v43 = vpop.f32.mrb[19].mxu0 }
 0x55b   : > { %v1277_v44 = vpop.f32.mrb[16].mxu1 }
 0x55c   : > { %v1546_v45 = vpack.c.bf16 %v1277_v44, %v1277_v44  ;;  %v1645_v46 = vpop.f32.mrb[17].mxu1 }
 0x55d   : > { %v1280_v47 = vpop.f32.mrb[18].mxu1 }
 0x55e   : > { %1303 = vst.msk [vmem:[%s465_s27 + $0xc] sm:$0xf] %vm1299_vm7, %v1546_v45  ;;  %v1646_v48 = vpop.f32.mrb[19].mxu1 }
 0x55f PF: > { %s25_s14 = sadd.s32 1, %s1935_s14   ;;  %s2391_s30 = smov %s1919_s10 }
 0x560   : > { %p22_p4 = scmp.ge.s32.totalorder %s25_s14, 4   ;;  %s2392_s10 = smov %s1923_s11 }
 0x561   : > { %s2393_s11 = smov %s2157_s25  ;;  %s2394_s12 = smov %s1931_s13 }
 0x562   : > { %s2395_s13 = smov %s2397_s5  ;;  %24 = sbr.rel (!%p22_p4) target bundleno = 10 (0xa), region = 135 }
 0x569   :  { %1361 = vsyncpa [#allocation4], 1 }
 0x56a   :  { %1363 = vsyncpa [#allocation4 + $0x1], 1 }
 0x56b   :  { %1364 = vsyncpa [#allocation6], 1 }
 0x56c   :  { %1365 = vsyncpa [#allocation9], 1 }

</bundles_post_ra>
